<compile_context>
chip_gen: v7x
topology: tpu7x:2x2x1
jax: 0.10.0
libtpu: 0.0.40
codegen_flags: <defaults>
</compile_context>

<pallas_src>
import functools

import jax
import jax.numpy as jnp
from jax import lax
from jax.experimental import pallas as pl
from jax.experimental.pallas import tpu as pltpu


def _attention_kernel(x_ref, noise_ref, gamma_ref, beta_ref,
                      wq_ref, wk_ref, wv_ref,
                      bq_ref, bk_ref, bv_ref,
                      wproj_ref, bproj_ref,
                      o_ref, *, num_heads, head_dim, eps):
    """One grid step == `block_b` batch elements; all hot math stays in VMEM."""
    block_b, N, D = x_ref.shape
    rows = block_b * N
    scale = head_dim ** -0.5

    # ---- x * global_noise_info, then LayerNorm over D (f32 on the VPU) ----------
    x = x_ref[...].astype(jnp.float32) * noise_ref[...].astype(jnp.float32)
    mean = jnp.mean(x, axis=-1, keepdims=True)
    xc = x - mean
    var = jnp.mean(xc * xc, axis=-1, keepdims=True)
    xn = xc * lax.rsqrt(var + eps)
    xn = xn * gamma_ref[...] + beta_ref[...]                 # (1, D) broadcasts

    # One bf16 copy of the normalized activations, reused by all 3*H projections.
    # (rows, D) <- (block_b, N, D): merges a leading dim into the 8-aligned
    # sublane dim (N == 8), which is a free, layout-preserving reshape.
    x_bf = xn.reshape(rows, D).astype(jnp.bfloat16)

    # ---- per-head attention; head slicing lives in the *weights* (wrapper-side),
    #      so there is no lane slicing or lane concatenation of activations here.
    out = jnp.zeros((rows, D), jnp.float32)
    for h in range(num_heads):                                # short static loop
        qh = jnp.dot(x_bf, wq_ref[h], preferred_element_type=jnp.float32) + bq_ref[h]
        kh = jnp.dot(x_bf, wk_ref[h], preferred_element_type=jnp.float32) + bk_ref[h]
        vh = jnp.dot(x_bf, wv_ref[h], preferred_element_type=jnp.float32) + bv_ref[h]
        q3 = qh.reshape(block_b, N, head_dim).astype(jnp.bfloat16)
        k3 = kh.reshape(block_b, N, head_dim).astype(jnp.bfloat16)
        v3 = vh.reshape(block_b, N, head_dim).astype(jnp.bfloat16)

        s = jnp.einsum('bqd,bkd->bqk', q3, k3,
                       preferred_element_type=jnp.float32) * scale
        s = s - jnp.max(s, axis=-1, keepdims=True)
        p = jnp.exp(s)                                        # f32 on the EUP
        # approx reciprocal: EUP slot, ~free; rows don't sum to exactly 1 (noted
        # in the review as acceptable at this tolerance).
        p = p * pl.reciprocal(jnp.sum(p, axis=-1, keepdims=True), approx=True)

        ctx = jnp.einsum('bqk,bkd->bqd', p.astype(jnp.bfloat16), v3,
                         preferred_element_type=jnp.float32)  # (block_b, N, hd)
        # Fold this head straight into the output projection: identical to
        # concat(ctx_heads, -1) @ Wproj but with zero XLU concat work.
        out = out + jnp.dot(ctx.reshape(rows, head_dim).astype(jnp.bfloat16),
                            wproj_ref[h], preferred_element_type=jnp.float32)

    out = out + bproj_ref[...]
    # D is a multiple of 128 lanes here -> unmasked, lane-dense stores.
    o_ref[...] = out.reshape(block_b, N, D).astype(o_ref.dtype)


def _num_tensorcores():
    """Best-effort TensorCores-per-chip (2 on v7x, 1 on v5e/v6e)."""
    try:
        info = pltpu.get_tpu_info()
    except Exception:
        return 1
    for attr in ("num_cores", "core_count", "cores_per_chip", "num_tensorcores"):
        v = getattr(info, attr, None)
        if isinstance(v, int) and v > 0:
            return v
    name = (str(getattr(info, "chip_version", "")) + str(getattr(info, "chip", ""))).upper()
    if "V7" in name or "7X" in name:
        return 2
    return 1


def _pick_block_b(B, N, *, num_tc=None, rows_cap=2048, rows_per_tc=256):
    """Maximize rows per grid step (the grid is a serial loop on a single TC, so
    extra steps are pure ~0.35us/step overhead and a smaller GEMM M dim). Only
    split into multiple steps when the chip has >1 TensorCore AND every step
    still keeps >= rows_per_tc rows."""
    if num_tc is None:
        num_tc = _num_tensorcores()
    divisors = [d for d in range(1, B + 1) if B % d == 0]
    block_b = max([d for d in divisors if d * N <= rows_cap] or [1])
    if num_tc > 1:
        for d in sorted(divisors, reverse=True):
            if d < block_b and d * N >= rows_per_tc and (B // d) >= num_tc:
                block_b = d
                break
    return block_b


def _vmem_limit_bytes(block_b, N, D, num_heads, head_dim):
    """Rough per-step VMEM need with headroom, capped at v7x's 64 MiB."""
    f32, bf16 = 4, 2
    act = block_b * N * D * f32                       # one x/out tile
    noise = block_b * D * f32
    wgt = 4 * num_heads * D * head_dim * bf16         # wq + wk + wv + wproj
    small = (3 * num_heads * head_dim + 4 * D) * f32  # biases + LN params
    # x / noise / out tiles and (constant-index) weights are double-buffered.
    need = 2 * (2 * act + noise) + 2 * (wgt + small) + (8 << 20)
    return int(min(64 << 20, max(need, 32 << 20)))


def attention_module_forward(x, noise, params, *, num_heads, eps=1e-5, block_b=None):
    """x: (B, N, D) float32, noise: (B, 1, D) float32."""
    B, N, D = x.shape
    assert D % num_heads == 0
    head_dim = D // num_heads
    if block_b is None:
        block_b = _pick_block_b(B, N)
    assert B % block_b == 0

    gamma, beta = params["gamma"], params["beta"]
    bproj = params["bproj"]

    # ---- wrapper-side (one-time) weight re-layout: per-head blocks, bf16 --------
    # qkv Linear columns are ordered [q | k | v], head-major within each D block
    # (matches the PyTorch reshape(B,N,3,H,hd).permute(...)).
    wqkv = params["wqkv"]                              # (D, 3D), (in, out)
    bqkv = params["bqkv"][0]                           # (3D,)
    def split_heads_cols(w):                           # (D, D) -> (H, D, hd)
        return w.reshape(D, num_heads, head_dim).transpose(1, 0, 2)
    wq = split_heads_cols(wqkv[:, 0 * D:1 * D]).astype(jnp.bfloat16)
    wk = split_heads_cols(wqkv[:, 1 * D:2 * D]).astype(jnp.bfloat16)
    wv = split_heads_cols(wqkv[:, 2 * D:3 * D]).astype(jnp.bfloat16)
    bq = bqkv[0 * D:1 * D].reshape(num_heads, 1, head_dim)
    bk = bqkv[1 * D:2 * D].reshape(num_heads, 1, head_dim)
    bv = bqkv[2 * D:3 * D].reshape(num_heads, 1, head_dim)
    wproj = params["wproj"].reshape(num_heads, head_dim, D).astype(jnp.bfloat16)

    kernel = functools.partial(_attention_kernel, num_heads=num_heads,
                               head_dim=head_dim, eps=eps)
    const = lambda shape: pl.BlockSpec(shape, lambda b: (0,) * len(shape))

    # NOTE(production D): add a K-tiling grid axis (reduction last, "arbitrary")
    # with an f32 VMEM accumulator + pl.when init/finalize, and single-buffer the
    # constant weight specs (pipeline_mode=pl.Buffered(1)) when weights stop
    # fitting comfortably in v7x's 64 MiB VMEM.
    return pl.pallas_call(
        kernel,
        out_shape=jax.ShapeDtypeStruct((B, N, D), x.dtype),
        grid_spec=pltpu.PrefetchScalarGridSpec(
            num_scalar_prefetch=0,
            grid=(B // block_b,),
            in_specs=[
                pl.BlockSpec((block_b, N, D), lambda b: (b, 0, 0)),   # x
                pl.BlockSpec((block_b, 1, D), lambda b: (b, 0, 0)),   # noise
                const((1, D)),                    # layernorm gamma (f32)
                const((1, D)),                    # layernorm beta  (f32)
                const((num_heads, D, head_dim)),  # wq (bf16)
                const((num_heads, D, head_dim)),  # wk (bf16)
                const((num_heads, D, head_dim)),  # wv (bf16)
                const((num_heads, 1, head_dim)),  # bq (f32)
                const((num_heads, 1, head_dim)),  # bk (f32)
                const((num_heads, 1, head_dim)),  # bv (f32)
                const((num_heads, head_dim, D)),  # wproj (bf16)
                const((1, D)),                    # bproj (f32)
            ],
            out_specs=pl.BlockSpec((block_b, N, D), lambda b: (b, 0, 0)),
        ),
        compiler_params=pltpu.CompilerParams(
            dimension_semantics=("parallel",),
            vmem_limit_bytes=_vmem_limit_bytes(block_b, N, D, num_heads, head_dim)),
    )(x, noise, gamma, beta, wq, wk, wv, bq, bk, bv, wproj, bproj)


def _reference(x, noise, params, *, num_heads, eps=1e-5):
    """Pure-JAX f32 reference matching the PyTorch forward semantics."""
    B, N, D = x.shape
    hd = D // num_heads
    x = x * noise
    mean = jnp.mean(x, axis=-1, keepdims=True)
    var = jnp.mean((x - mean) ** 2, axis=-1, keepdims=True)
    xn = (x - mean) / jnp.sqrt(var + eps) * params["gamma"][0] + params["beta"][0]
    qkv = xn @ params["wqkv"] + params["bqkv"][0]
    qkv = qkv.reshape(B, N, 3, num_heads, hd).transpose(2, 0, 3, 1, 4)
    q, k, v = qkv[0], qkv[1], qkv[2]
    s = jnp.einsum("bhqd,bhkd->bhqk", q, k) * (hd ** -0.5)
    p = jax.nn.softmax(s, axis=-1)
    o = jnp.einsum("bhqk,bhkd->bhqd", p, v).transpose(0, 2, 1, 3).reshape(B, N, D)
    return o @ params["wproj"] + params["bproj"][0]


if __name__ == "__main__":
    # Small shapes consistent with the module (module default window_size=8):
    #   feature_dim=4, window_size=8 -> D = 8*8*4 = 256 (multiple of 128 lanes,
    #   so all kernel I/O is lane-dense); num_heads=4 -> head_dim=64; B=2; N=8.
    feature_dim, window_size, num_heads = 4, 8, 4
    D = window_size ** 2 * feature_dim
    B, N = 2, 8

    key = jax.random.PRNGKey(0)
    k_x, k_n, k_wqkv, k_bqkv, k_wp, k_bp = jax.random.split(key, 6)

    x = jax.random.normal(k_x, (B, N, D), dtype=jnp.float32)
    noise = jax.random.normal(k_n, (B, 1, D), dtype=jnp.float32)

    params = {
        # LayerNorm(window_size**2 * feature_dim) params
        "gamma": jnp.ones((1, D), jnp.float32),
        "beta": jnp.zeros((1, D), jnp.float32),
        # Attention: qkv Linear(D, 3D, bias=True), proj Linear(D, D, bias=True)
        # (weights stored as (in, out) == PyTorch weight transposed)
        "wqkv": 0.05 * jax.random.normal(k_wqkv, (D, 3 * D), jnp.float32),
        "bqkv": 0.01 * jax.random.normal(k_bqkv, (1, 3 * D), jnp.float32),
        "wproj": 0.05 * jax.random.normal(k_wp, (D, D), jnp.float32),
        "bproj": 0.01 * jax.random.normal(k_bp, (1, D), jnp.float32),
    }

    out = attention_module_forward(x, noise, params, num_heads=num_heads)
    out = jax.block_until_ready(out)

    ref = _reference(x, noise, params, num_heads=num_heads)
    assert out.shape == (B, N, D)
    # bf16 MXU inputs (f32 accumulation) + approx softmax reciprocal -> allow a
    # few e-2 of absolute error vs. the pure-f32 reference (outputs are O(0.3)).
    assert jnp.max(jnp.abs(out - ref)) < 5e-2, "mismatch vs pure-JAX reference"

    print("KERNEL_OK")
</pallas_src>

<mosaic_0001>
module attributes {stable_mosaic.version = 11 : i64} {
  func.func @_attention_kernel(%arg0: i32, %arg1: memref<2x8x256xf32, #tpu.memory_space<vmem>>, %arg2: memref<2x1x256xf32, #tpu.memory_space<vmem>>, %arg3: memref<1x256xf32, #tpu.memory_space<vmem>>, %arg4: memref<1x256xf32, #tpu.memory_space<vmem>>, %arg5: memref<4x256x64xbf16, #tpu.memory_space<vmem>>, %arg6: memref<4x256x64xbf16, #tpu.memory_space<vmem>>, %arg7: memref<4x256x64xbf16, #tpu.memory_space<vmem>>, %arg8: memref<4x1x64xf32, #tpu.memory_space<vmem>>, %arg9: memref<4x1x64xf32, #tpu.memory_space<vmem>>, %arg10: memref<4x1x64xf32, #tpu.memory_space<vmem>>, %arg11: memref<4x64x256xbf16, #tpu.memory_space<vmem>>, %arg12: memref<1x256xf32, #tpu.memory_space<vmem>>, %arg13: memref<2x8x256xf32, #tpu.memory_space<vmem>>) attributes {dimension_semantics = [#tpu.dimension_semantics<parallel>], iteration_bounds = array<i64: 1>, scalar_prefetch = 0 : i64, scratch_operands = 0 : i64, tpu.core_type = #tpu.core_type<tc>, window_params = [{transform_indices = @transform_0, window_bounds = array<i64: 2, 8, 256>}, {transform_indices = @transform_1, window_bounds = array<i64: 2, 1, 256>}, {pipeline_mode = #tpu.pipeline_mode<synchronous>, transform_indices = @transform_2, window_bounds = array<i64: 1, 256>}, {pipeline_mode = #tpu.pipeline_mode<synchronous>, transform_indices = @transform_3, window_bounds = array<i64: 1, 256>}, {pipeline_mode = #tpu.pipeline_mode<synchronous>, transform_indices = @transform_4, window_bounds = array<i64: 4, 256, 64>}, {pipeline_mode = #tpu.pipeline_mode<synchronous>, transform_indices = @transform_5, window_bounds = array<i64: 4, 256, 64>}, {pipeline_mode = #tpu.pipeline_mode<synchronous>, transform_indices = @transform_6, window_bounds = array<i64: 4, 256, 64>}, {pipeline_mode = #tpu.pipeline_mode<synchronous>, transform_indices = @transform_7, window_bounds = array<i64: 4, 1, 64>}, {pipeline_mode = #tpu.pipeline_mode<synchronous>, transform_indices = @transform_8, window_bounds = array<i64: 4, 1, 64>}, {pipeline_mode = #tpu.pipeline_mode<synchronous>, transform_indices = @transform_9, window_bounds = array<i64: 4, 1, 64>}, {pipeline_mode = #tpu.pipeline_mode<synchronous>, transform_indices = @transform_10, window_bounds = array<i64: 4, 64, 256>}, {pipeline_mode = #tpu.pipeline_mode<synchronous>, transform_indices = @transform_11, window_bounds = array<i64: 1, 256>}, {transform_indices = @transform_12, window_bounds = array<i64: 2, 8, 256>}]} {
    %c0 = arith.constant 0 : index
    %c0_0 = arith.constant 0 : index
    %c0_1 = arith.constant 0 : index
    %0 = vector.load %arg1[%c0, %c0_0, %c0_1] : memref<2x8x256xf32, #tpu.memory_space<vmem>>, vector<2x8x256xf32>
    %c0_2 = arith.constant 0 : index
    %c0_3 = arith.constant 0 : index
    %c0_4 = arith.constant 0 : index
    %1 = vector.load %arg2[%c0_2, %c0_3, %c0_4] : memref<2x1x256xf32, #tpu.memory_space<vmem>>, vector<2x1x256xf32>
    %2 = vector.broadcast %1 : vector<2x1x256xf32> to vector<2x8x256xf32>
    %3 = arith.mulf %0, %2 : vector<2x8x256xf32>
    %cst = arith.constant dense<0.000000e+00> : vector<2x8xf32>
    %4 = vector.multi_reduction <add>, %3, %cst [2] : vector<2x8x256xf32> to vector<2x8xf32>
    %5 = vector.shape_cast %4 : vector<2x8xf32> to vector<2x8x1xf32>
    %cst_5 = arith.constant 2.560000e+02 : f32
    %6 = vector.broadcast %cst_5 : f32 to vector<2x8x1xf32>
    %7 = arith.divf %5, %6 : vector<2x8x1xf32>
    %8 = vector.broadcast %7 : vector<2x8x1xf32> to vector<2x8x256xf32>
    %9 = arith.subf %3, %8 : vector<2x8x256xf32>
    %10 = arith.mulf %9, %9 : vector<2x8x256xf32>
    %cst_6 = arith.constant dense<0.000000e+00> : vector<2x8xf32>
    %11 = vector.multi_reduction <add>, %10, %cst_6 [2] : vector<2x8x256xf32> to vector<2x8xf32>
    %12 = vector.shape_cast %11 : vector<2x8xf32> to vector<2x8x1xf32>
    %cst_7 = arith.constant 2.560000e+02 : f32
    %13 = vector.broadcast %cst_7 : f32 to vector<2x8x1xf32>
    %14 = arith.divf %12, %13 : vector<2x8x1xf32>
    %cst_8 = arith.constant 9.99999974E-6 : f32
    %15 = vector.broadcast %cst_8 : f32 to vector<2x8x1xf32>
    %16 = arith.addf %14, %15 : vector<2x8x1xf32>
    %17 = math.rsqrt %16 : vector<2x8x1xf32>
    %18 = vector.broadcast %17 : vector<2x8x1xf32> to vector<2x8x256xf32>
    %19 = arith.mulf %9, %18 : vector<2x8x256xf32>
    %c0_9 = arith.constant 0 : index
    %c0_10 = arith.constant 0 : index
    %20 = vector.load %arg3[%c0_9, %c0_10] : memref<1x256xf32, #tpu.memory_space<vmem>>, vector<1x256xf32>
    %21 = vector.shape_cast %20 : vector<1x256xf32> to vector<1x1x256xf32>
    %22 = vector.broadcast %21 : vector<1x1x256xf32> to vector<2x8x256xf32>
    %23 = arith.mulf %19, %22 : vector<2x8x256xf32>
    %c0_11 = arith.constant 0 : index
    %c0_12 = arith.constant 0 : index
    %24 = vector.load %arg4[%c0_11, %c0_12] : memref<1x256xf32, #tpu.memory_space<vmem>>, vector<1x256xf32>
    %25 = vector.shape_cast %24 : vector<1x256xf32> to vector<1x1x256xf32>
    %26 = vector.broadcast %25 : vector<1x1x256xf32> to vector<2x8x256xf32>
    %27 = arith.addf %23, %26 : vector<2x8x256xf32>
    %28 = vector.shape_cast %27 : vector<2x8x256xf32> to vector<16x256xf32>
    %29 = arith.truncf %28 : vector<16x256xf32> to vector<16x256xbf16>
    %cst_13 = arith.constant 0.000000e+00 : f32
    %30 = vector.broadcast %cst_13 : f32 to vector<16x256xf32>
    %c0_14 = arith.constant 0 : index
    %c0_15 = arith.constant 0 : index
    %c0_16 = arith.constant 0 : index
    %31 = vector.load %arg5[%c0_14, %c0_15, %c0_16] : memref<4x256x64xbf16, #tpu.memory_space<vmem>>, vector<1x256x64xbf16>
    %32 = vector.shape_cast %31 : vector<1x256x64xbf16> to vector<256x64xbf16>
    %cst_17 = arith.constant dense<0.000000e+00> : vector<16x64xf32>
    %33 = tpu.matmul %29, %32, %cst_17 {dimension_numbers = #tpu.dot_dimension_numbers<[1], [0], [0], [1], [0, 0, 1, 1], [], []>} : vector<16x256xbf16>, vector<256x64xbf16>, vector<16x64xf32> -> vector<16x64xf32>
    %c0_18 = arith.constant 0 : index
    %c0_19 = arith.constant 0 : index
    %c0_20 = arith.constant 0 : index
    %34 = vector.load %arg8[%c0_18, %c0_19, %c0_20] : memref<4x1x64xf32, #tpu.memory_space<vmem>>, vector<1x1x64xf32>
    %35 = vector.shape_cast %34 : vector<1x1x64xf32> to vector<1x64xf32>
    %36 = vector.broadcast %35 : vector<1x64xf32> to vector<16x64xf32>
    %37 = arith.addf %33, %36 : vector<16x64xf32>
    %c0_21 = arith.constant 0 : index
    %c0_22 = arith.constant 0 : index
    %c0_23 = arith.constant 0 : index
    %38 = vector.load %arg6[%c0_21, %c0_22, %c0_23] : memref<4x256x64xbf16, #tpu.memory_space<vmem>>, vector<1x256x64xbf16>
    %39 = vector.shape_cast %38 : vector<1x256x64xbf16> to vector<256x64xbf16>
    %cst_24 = arith.constant dense<0.000000e+00> : vector<16x64xf32>
    %40 = tpu.matmul %29, %39, %cst_24 {dimension_numbers = #tpu.dot_dimension_numbers<[1], [0], [0], [1], [0, 0, 1, 1], [], []>} : vector<16x256xbf16>, vector<256x64xbf16>, vector<16x64xf32> -> vector<16x64xf32>
    %c0_25 = arith.constant 0 : index
    %c0_26 = arith.constant 0 : index
    %c0_27 = arith.constant 0 : index
    %41 = vector.load %arg9[%c0_25, %c0_26, %c0_27] : memref<4x1x64xf32, #tpu.memory_space<vmem>>, vector<1x1x64xf32>
    %42 = vector.shape_cast %41 : vector<1x1x64xf32> to vector<1x64xf32>
    %43 = vector.broadcast %42 : vector<1x64xf32> to vector<16x64xf32>
    %44 = arith.addf %40, %43 : vector<16x64xf32>
    %c0_28 = arith.constant 0 : index
    %c0_29 = arith.constant 0 : index
    %c0_30 = arith.constant 0 : index
    %45 = vector.load %arg7[%c0_28, %c0_29, %c0_30] : memref<4x256x64xbf16, #tpu.memory_space<vmem>>, vector<1x256x64xbf16>
    %46 = vector.shape_cast %45 : vector<1x256x64xbf16> to vector<256x64xbf16>
    %cst_31 = arith.constant dense<0.000000e+00> : vector<16x64xf32>
    %47 = tpu.matmul %29, %46, %cst_31 {dimension_numbers = #tpu.dot_dimension_numbers<[1], [0], [0], [1], [0, 0, 1, 1], [], []>} : vector<16x256xbf16>, vector<256x64xbf16>, vector<16x64xf32> -> vector<16x64xf32>
    %c0_32 = arith.constant 0 : index
    %c0_33 = arith.constant 0 : index
    %c0_34 = arith.constant 0 : index
    %48 = vector.load %arg10[%c0_32, %c0_33, %c0_34] : memref<4x1x64xf32, #tpu.memory_space<vmem>>, vector<1x1x64xf32>
    %49 = vector.shape_cast %48 : vector<1x1x64xf32> to vector<1x64xf32>
    %50 = vector.broadcast %49 : vector<1x64xf32> to vector<16x64xf32>
    %51 = arith.addf %47, %50 : vector<16x64xf32>
    %52 = vector.shape_cast %37 : vector<16x64xf32> to vector<2x8x64xf32>
    %53 = arith.truncf %52 : vector<2x8x64xf32> to vector<2x8x64xbf16>
    %54 = vector.shape_cast %44 : vector<16x64xf32> to vector<2x8x64xf32>
    %55 = arith.truncf %54 : vector<2x8x64xf32> to vector<2x8x64xbf16>
    %56 = vector.shape_cast %51 : vector<16x64xf32> to vector<2x8x64xf32>
    %57 = arith.truncf %56 : vector<2x8x64xf32> to vector<2x8x64xbf16>
    "tpu.trace_start"() <{level = 10 : i32, message = "bqd,bkd->bqk"}> : () -> ()
    %cst_35 = arith.constant dense<0.000000e+00> : vector<2x8x8xf32>
    %58 = tpu.matmul %53, %55, %cst_35 {dimension_numbers = #tpu.dot_dimension_numbers<[2], [2], [1], [1], [0, 0, 0, 1, 1, 1], [0], [0]>} : vector<2x8x64xbf16>, vector<2x8x64xbf16>, vector<2x8x8xf32> -> vector<2x8x8xf32>
    "tpu.trace_stop"() : () -> ()
    %cst_36 = arith.constant 1.250000e-01 : f32
    %59 = vector.broadcast %cst_36 : f32 to vector<2x8x8xf32>
    %60 = arith.mulf %58, %59 : vector<2x8x8xf32>
    %cst_37 = arith.constant dense<0xFF800000> : vector<2x8xf32>
    %61 = vector.multi_reduction <maximumf>, %60, %cst_37 [2] : vector<2x8x8xf32> to vector<2x8xf32>
    %62 = vector.shape_cast %61 : vector<2x8xf32> to vector<2x8x1xf32>
    %63 = vector.broadcast %62 : vector<2x8x1xf32> to vector<2x8x8xf32>
    %64 = arith.subf %60, %63 : vector<2x8x8xf32>
    %65 = math.exp %64 : vector<2x8x8xf32>
    %cst_38 = arith.constant dense<0.000000e+00> : vector<2x8xf32>
    %66 = vector.multi_reduction <add>, %65, %cst_38 [2] : vector<2x8x8xf32> to vector<2x8xf32>
    %67 = vector.shape_cast %66 : vector<2x8xf32> to vector<2x8x1xf32>
    %68 = tpu.reciprocal %67 {approx = true} : vector<2x8x1xf32> -> vector<2x8x1xf32>
    %69 = vector.broadcast %68 : vector<2x8x1xf32> to vector<2x8x8xf32>
    %70 = arith.mulf %65, %69 : vector<2x8x8xf32>
    %71 = arith.truncf %70 : vector<2x8x8xf32> to vector<2x8x8xbf16>
    "tpu.trace_start"() <{level = 10 : i32, message = "bqk,bkd->bqd"}> : () -> ()
    %cst_39 = arith.constant dense<0.000000e+00> : vector<2x8x64xf32>
    %72 = tpu.matmul %71, %57, %cst_39 {dimension_numbers = #tpu.dot_dimension_numbers<[2], [1], [1], [2], [0, 0, 0, 1, 1, 2], [0], [0]>} : vector<2x8x8xbf16>, vector<2x8x64xbf16>, vector<2x8x64xf32> -> vector<2x8x64xf32>
    "tpu.trace_stop"() : () -> ()
    %73 = vector.shape_cast %72 : vector<2x8x64xf32> to vector<16x64xf32>
    %74 = arith.truncf %73 : vector<16x64xf32> to vector<16x64xbf16>
    %c0_40 = arith.constant 0 : index
    %c0_41 = arith.constant 0 : index
    %c0_42 = arith.constant 0 : index
    %75 = vector.load %arg11[%c0_40, %c0_41, %c0_42] : memref<4x64x256xbf16, #tpu.memory_space<vmem>>, vector<1x64x256xbf16>
    %76 = vector.shape_cast %75 : vector<1x64x256xbf16> to vector<64x256xbf16>
    %cst_43 = arith.constant dense<0.000000e+00> : vector<16x256xf32>
    %77 = tpu.matmul %74, %76, %cst_43 {dimension_numbers = #tpu.dot_dimension_numbers<[1], [0], [0], [1], [0, 0, 1, 1], [], []>} : vector<16x64xbf16>, vector<64x256xbf16>, vector<16x256xf32> -> vector<16x256xf32>
    %78 = arith.addf %30, %77 : vector<16x256xf32>
    %c1 = arith.constant 1 : index
    %c0_44 = arith.constant 0 : index
    %c0_45 = arith.constant 0 : index
    %79 = vector.load %arg5[%c1, %c0_44, %c0_45] : memref<4x256x64xbf16, #tpu.memory_space<vmem>>, vector<1x256x64xbf16>
    %80 = vector.shape_cast %79 : vector<1x256x64xbf16> to vector<256x64xbf16>
    %cst_46 = arith.constant dense<0.000000e+00> : vector<16x64xf32>
    %81 = tpu.matmul %29, %80, %cst_46 {dimension_numbers = #tpu.dot_dimension_numbers<[1], [0], [0], [1], [0, 0, 1, 1], [], []>} : vector<16x256xbf16>, vector<256x64xbf16>, vector<16x64xf32> -> vector<16x64xf32>
    %c1_47 = arith.constant 1 : index
    %c0_48 = arith.constant 0 : index
    %c0_49 = arith.constant 0 : index
    %82 = vector.load %arg8[%c1_47, %c0_48, %c0_49] : memref<4x1x64xf32, #tpu.memory_space<vmem>>, vector<1x1x64xf32>
    %83 = vector.shape_cast %82 : vector<1x1x64xf32> to vector<1x64xf32>
    %84 = vector.broadcast %83 : vector<1x64xf32> to vector<16x64xf32>
    %85 = arith.addf %81, %84 : vector<16x64xf32>
    %c1_50 = arith.constant 1 : index
    %c0_51 = arith.constant 0 : index
    %c0_52 = arith.constant 0 : index
    %86 = vector.load %arg6[%c1_50, %c0_51, %c0_52] : memref<4x256x64xbf16, #tpu.memory_space<vmem>>, vector<1x256x64xbf16>
    %87 = vector.shape_cast %86 : vector<1x256x64xbf16> to vector<256x64xbf16>
    %cst_53 = arith.constant dense<0.000000e+00> : vector<16x64xf32>
    %88 = tpu.matmul %29, %87, %cst_53 {dimension_numbers = #tpu.dot_dimension_numbers<[1], [0], [0], [1], [0, 0, 1, 1], [], []>} : vector<16x256xbf16>, vector<256x64xbf16>, vector<16x64xf32> -> vector<16x64xf32>
    %c1_54 = arith.constant 1 : index
    %c0_55 = arith.constant 0 : index
    %c0_56 = arith.constant 0 : index
    %89 = vector.load %arg9[%c1_54, %c0_55, %c0_56] : memref<4x1x64xf32, #tpu.memory_space<vmem>>, vector<1x1x64xf32>
    %90 = vector.shape_cast %89 : vector<1x1x64xf32> to vector<1x64xf32>
    %91 = vector.broadcast %90 : vector<1x64xf32> to vector<16x64xf32>
    %92 = arith.addf %88, %91 : vector<16x64xf32>
    %c1_57 = arith.constant 1 : index
    %c0_58 = arith.constant 0 : index
    %c0_59 = arith.constant 0 : index
    %93 = vector.load %arg7[%c1_57, %c0_58, %c0_59] : memref<4x256x64xbf16, #tpu.memory_space<vmem>>, vector<1x256x64xbf16>
    %94 = vector.shape_cast %93 : vector<1x256x64xbf16> to vector<256x64xbf16>
    %cst_60 = arith.constant dense<0.000000e+00> : vector<16x64xf32>
    %95 = tpu.matmul %29, %94, %cst_60 {dimension_numbers = #tpu.dot_dimension_numbers<[1], [0], [0], [1], [0, 0, 1, 1], [], []>} : vector<16x256xbf16>, vector<256x64xbf16>, vector<16x64xf32> -> vector<16x64xf32>
    %c1_61 = arith.constant 1 : index
    %c0_62 = arith.constant 0 : index
    %c0_63 = arith.constant 0 : index
    %96 = vector.load %arg10[%c1_61, %c0_62, %c0_63] : memref<4x1x64xf32, #tpu.memory_space<vmem>>, vector<1x1x64xf32>
    %97 = vector.shape_cast %96 : vector<1x1x64xf32> to vector<1x64xf32>
    %98 = vector.broadcast %97 : vector<1x64xf32> to vector<16x64xf32>
    %99 = arith.addf %95, %98 : vector<16x64xf32>
    %100 = vector.shape_cast %85 : vector<16x64xf32> to vector<2x8x64xf32>
    %101 = arith.truncf %100 : vector<2x8x64xf32> to vector<2x8x64xbf16>
    %102 = vector.shape_cast %92 : vector<16x64xf32> to vector<2x8x64xf32>
    %103 = arith.truncf %102 : vector<2x8x64xf32> to vector<2x8x64xbf16>
    %104 = vector.shape_cast %99 : vector<16x64xf32> to vector<2x8x64xf32>
    %105 = arith.truncf %104 : vector<2x8x64xf32> to vector<2x8x64xbf16>
    "tpu.trace_start"() <{level = 10 : i32, message = "bqd,bkd->bqk"}> : () -> ()
    %cst_64 = arith.constant dense<0.000000e+00> : vector<2x8x8xf32>
    %106 = tpu.matmul %101, %103, %cst_64 {dimension_numbers = #tpu.dot_dimension_numbers<[2], [2], [1], [1], [0, 0, 0, 1, 1, 1], [0], [0]>} : vector<2x8x64xbf16>, vector<2x8x64xbf16>, vector<2x8x8xf32> -> vector<2x8x8xf32>
    "tpu.trace_stop"() : () -> ()
    %cst_65 = arith.constant 1.250000e-01 : f32
    %107 = vector.broadcast %cst_65 : f32 to vector<2x8x8xf32>
    %108 = arith.mulf %106, %107 : vector<2x8x8xf32>
    %cst_66 = arith.constant dense<0xFF800000> : vector<2x8xf32>
    %109 = vector.multi_reduction <maximumf>, %108, %cst_66 [2] : vector<2x8x8xf32> to vector<2x8xf32>
    %110 = vector.shape_cast %109 : vector<2x8xf32> to vector<2x8x1xf32>
    %111 = vector.broadcast %110 : vector<2x8x1xf32> to vector<2x8x8xf32>
    %112 = arith.subf %108, %111 : vector<2x8x8xf32>
    %113 = math.exp %112 : vector<2x8x8xf32>
    %cst_67 = arith.constant dense<0.000000e+00> : vector<2x8xf32>
    %114 = vector.multi_reduction <add>, %113, %cst_67 [2] : vector<2x8x8xf32> to vector<2x8xf32>
    %115 = vector.shape_cast %114 : vector<2x8xf32> to vector<2x8x1xf32>
    %116 = tpu.reciprocal %115 {approx = true} : vector<2x8x1xf32> -> vector<2x8x1xf32>
    %117 = vector.broadcast %116 : vector<2x8x1xf32> to vector<2x8x8xf32>
    %118 = arith.mulf %113, %117 : vector<2x8x8xf32>
    %119 = arith.truncf %118 : vector<2x8x8xf32> to vector<2x8x8xbf16>
    "tpu.trace_start"() <{level = 10 : i32, message = "bqk,bkd->bqd"}> : () -> ()
    %cst_68 = arith.constant dense<0.000000e+00> : vector<2x8x64xf32>
    %120 = tpu.matmul %119, %105, %cst_68 {dimension_numbers = #tpu.dot_dimension_numbers<[2], [1], [1], [2], [0, 0, 0, 1, 1, 2], [0], [0]>} : vector<2x8x8xbf16>, vector<2x8x64xbf16>, vector<2x8x64xf32> -> vector<2x8x64xf32>
    "tpu.trace_stop"() : () -> ()
    %121 = vector.shape_cast %120 : vector<2x8x64xf32> to vector<16x64xf32>
    %122 = arith.truncf %121 : vector<16x64xf32> to vector<16x64xbf16>
    %c1_69 = arith.constant 1 : index
    %c0_70 = arith.constant 0 : index
    %c0_71 = arith.constant 0 : index
    %123 = vector.load %arg11[%c1_69, %c0_70, %c0_71] : memref<4x64x256xbf16, #tpu.memory_space<vmem>>, vector<1x64x256xbf16>
    %124 = vector.shape_cast %123 : vector<1x64x256xbf16> to vector<64x256xbf16>
    %cst_72 = arith.constant dense<0.000000e+00> : vector<16x256xf32>
    %125 = tpu.matmul %122, %124, %cst_72 {dimension_numbers = #tpu.dot_dimension_numbers<[1], [0], [0], [1], [0, 0, 1, 1], [], []>} : vector<16x64xbf16>, vector<64x256xbf16>, vector<16x256xf32> -> vector<16x256xf32>
    %126 = arith.addf %78, %125 : vector<16x256xf32>
    %c2 = arith.constant 2 : index
    %c0_73 = arith.constant 0 : index
    %c0_74 = arith.constant 0 : index
    %127 = vector.load %arg5[%c2, %c0_73, %c0_74] : memref<4x256x64xbf16, #tpu.memory_space<vmem>>, vector<1x256x64xbf16>
    %128 = vector.shape_cast %127 : vector<1x256x64xbf16> to vector<256x64xbf16>
    %cst_75 = arith.constant dense<0.000000e+00> : vector<16x64xf32>
    %129 = tpu.matmul %29, %128, %cst_75 {dimension_numbers = #tpu.dot_dimension_numbers<[1], [0], [0], [1], [0, 0, 1, 1], [], []>} : vector<16x256xbf16>, vector<256x64xbf16>, vector<16x64xf32> -> vector<16x64xf32>
    %c2_76 = arith.constant 2 : index
    %c0_77 = arith.constant 0 : index
    %c0_78 = arith.constant 0 : index
    %130 = vector.load %arg8[%c2_76, %c0_77, %c0_78] : memref<4x1x64xf32, #tpu.memory_space<vmem>>, vector<1x1x64xf32>
    %131 = vector.shape_cast %130 : vector<1x1x64xf32> to vector<1x64xf32>
    %132 = vector.broadcast %131 : vector<1x64xf32> to vector<16x64xf32>
    %133 = arith.addf %129, %132 : vector<16x64xf32>
    %c2_79 = arith.constant 2 : index
    %c0_80 = arith.constant 0 : index
    %c0_81 = arith.constant 0 : index
    %134 = vector.load %arg6[%c2_79, %c0_80, %c0_81] : memref<4x256x64xbf16, #tpu.memory_space<vmem>>, vector<1x256x64xbf16>
    %135 = vector.shape_cast %134 : vector<1x256x64xbf16> to vector<256x64xbf16>
    %cst_82 = arith.constant dense<0.000000e+00> : vector<16x64xf32>
    %136 = tpu.matmul %29, %135, %cst_82 {dimension_numbers = #tpu.dot_dimension_numbers<[1], [0], [0], [1], [0, 0, 1, 1], [], []>} : vector<16x256xbf16>, vector<256x64xbf16>, vector<16x64xf32> -> vector<16x64xf32>
    %c2_83 = arith.constant 2 : index
    %c0_84 = arith.constant 0 : index
    %c0_85 = arith.constant 0 : index
    %137 = vector.load %arg9[%c2_83, %c0_84, %c0_85] : memref<4x1x64xf32, #tpu.memory_space<vmem>>, vector<1x1x64xf32>
    %138 = vector.shape_cast %137 : vector<1x1x64xf32> to vector<1x64xf32>
    %139 = vector.broadcast %138 : vector<1x64xf32> to vector<16x64xf32>
    %140 = arith.addf %136, %139 : vector<16x64xf32>
    %c2_86 = arith.constant 2 : index
    %c0_87 = arith.constant 0 : index
    %c0_88 = arith.constant 0 : index
    %141 = vector.load %arg7[%c2_86, %c0_87, %c0_88] : memref<4x256x64xbf16, #tpu.memory_space<vmem>>, vector<1x256x64xbf16>
    %142 = vector.shape_cast %141 : vector<1x256x64xbf16> to vector<256x64xbf16>
    %cst_89 = arith.constant dense<0.000000e+00> : vector<16x64xf32>
    %143 = tpu.matmul %29, %142, %cst_89 {dimension_numbers = #tpu.dot_dimension_numbers<[1], [0], [0], [1], [0, 0, 1, 1], [], []>} : vector<16x256xbf16>, vector<256x64xbf16>, vector<16x64xf32> -> vector<16x64xf32>
    %c2_90 = arith.constant 2 : index
    %c0_91 = arith.constant 0 : index
    %c0_92 = arith.constant 0 : index
    %144 = vector.load %arg10[%c2_90, %c0_91, %c0_92] : memref<4x1x64xf32, #tpu.memory_space<vmem>>, vector<1x1x64xf32>
    %145 = vector.shape_cast %144 : vector<1x1x64xf32> to vector<1x64xf32>
    %146 = vector.broadcast %145 : vector<1x64xf32> to vector<16x64xf32>
    %147 = arith.addf %143, %146 : vector<16x64xf32>
    %148 = vector.shape_cast %133 : vector<16x64xf32> to vector<2x8x64xf32>
    %149 = arith.truncf %148 : vector<2x8x64xf32> to vector<2x8x64xbf16>
    %150 = vector.shape_cast %140 : vector<16x64xf32> to vector<2x8x64xf32>
    %151 = arith.truncf %150 : vector<2x8x64xf32> to vector<2x8x64xbf16>
    %152 = vector.shape_cast %147 : vector<16x64xf32> to vector<2x8x64xf32>
    %153 = arith.truncf %152 : vector<2x8x64xf32> to vector<2x8x64xbf16>
    "tpu.trace_start"() <{level = 10 : i32, message = "bqd,bkd->bqk"}> : () -> ()
    %cst_93 = arith.constant dense<0.000000e+00> : vector<2x8x8xf32>
    %154 = tpu.matmul %149, %151, %cst_93 {dimension_numbers = #tpu.dot_dimension_numbers<[2], [2], [1], [1], [0, 0, 0, 1, 1, 1], [0], [0]>} : vector<2x8x64xbf16>, vector<2x8x64xbf16>, vector<2x8x8xf32> -> vector<2x8x8xf32>
    "tpu.trace_stop"() : () -> ()
    %cst_94 = arith.constant 1.250000e-01 : f32
    %155 = vector.broadcast %cst_94 : f32 to vector<2x8x8xf32>
    %156 = arith.mulf %154, %155 : vector<2x8x8xf32>
    %cst_95 = arith.constant dense<0xFF800000> : vector<2x8xf32>
    %157 = vector.multi_reduction <maximumf>, %156, %cst_95 [2] : vector<2x8x8xf32> to vector<2x8xf32>
    %158 = vector.shape_cast %157 : vector<2x8xf32> to vector<2x8x1xf32>
    %159 = vector.broadcast %158 : vector<2x8x1xf32> to vector<2x8x8xf32>
    %160 = arith.subf %156, %159 : vector<2x8x8xf32>
    %161 = math.exp %160 : vector<2x8x8xf32>
    %cst_96 = arith.constant dense<0.000000e+00> : vector<2x8xf32>
    %162 = vector.multi_reduction <add>, %161, %cst_96 [2] : vector<2x8x8xf32> to vector<2x8xf32>
    %163 = vector.shape_cast %162 : vector<2x8xf32> to vector<2x8x1xf32>
    %164 = tpu.reciprocal %163 {approx = true} : vector<2x8x1xf32> -> vector<2x8x1xf32>
    %165 = vector.broadcast %164 : vector<2x8x1xf32> to vector<2x8x8xf32>
    %166 = arith.mulf %161, %165 : vector<2x8x8xf32>
    %167 = arith.truncf %166 : vector<2x8x8xf32> to vector<2x8x8xbf16>
    "tpu.trace_start"() <{level = 10 : i32, message = "bqk,bkd->bqd"}> : () -> ()
    %cst_97 = arith.constant dense<0.000000e+00> : vector<2x8x64xf32>
    %168 = tpu.matmul %167, %153, %cst_97 {dimension_numbers = #tpu.dot_dimension_numbers<[2], [1], [1], [2], [0, 0, 0, 1, 1, 2], [0], [0]>} : vector<2x8x8xbf16>, vector<2x8x64xbf16>, vector<2x8x64xf32> -> vector<2x8x64xf32>
    "tpu.trace_stop"() : () -> ()
    %169 = vector.shape_cast %168 : vector<2x8x64xf32> to vector<16x64xf32>
    %170 = arith.truncf %169 : vector<16x64xf32> to vector<16x64xbf16>
    %c2_98 = arith.constant 2 : index
    %c0_99 = arith.constant 0 : index
    %c0_100 = arith.constant 0 : index
    %171 = vector.load %arg11[%c2_98, %c0_99, %c0_100] : memref<4x64x256xbf16, #tpu.memory_space<vmem>>, vector<1x64x256xbf16>
    %172 = vector.shape_cast %171 : vector<1x64x256xbf16> to vector<64x256xbf16>
    %cst_101 = arith.constant dense<0.000000e+00> : vector<16x256xf32>
    %173 = tpu.matmul %170, %172, %cst_101 {dimension_numbers = #tpu.dot_dimension_numbers<[1], [0], [0], [1], [0, 0, 1, 1], [], []>} : vector<16x64xbf16>, vector<64x256xbf16>, vector<16x256xf32> -> vector<16x256xf32>
    %174 = arith.addf %126, %173 : vector<16x256xf32>
    %c3 = arith.constant 3 : index
    %c0_102 = arith.constant 0 : index
    %c0_103 = arith.constant 0 : index
    %175 = vector.load %arg5[%c3, %c0_102, %c0_103] : memref<4x256x64xbf16, #tpu.memory_space<vmem>>, vector<1x256x64xbf16>
    %176 = vector.shape_cast %175 : vector<1x256x64xbf16> to vector<256x64xbf16>
    %cst_104 = arith.constant dense<0.000000e+00> : vector<16x64xf32>
    %177 = tpu.matmul %29, %176, %cst_104 {dimension_numbers = #tpu.dot_dimension_numbers<[1], [0], [0], [1], [0, 0, 1, 1], [], []>} : vector<16x256xbf16>, vector<256x64xbf16>, vector<16x64xf32> -> vector<16x64xf32>
    %c3_105 = arith.constant 3 : index
    %c0_106 = arith.constant 0 : index
    %c0_107 = arith.constant 0 : index
    %178 = vector.load %arg8[%c3_105, %c0_106, %c0_107] : memref<4x1x64xf32, #tpu.memory_space<vmem>>, vector<1x1x64xf32>
    %179 = vector.shape_cast %178 : vector<1x1x64xf32> to vector<1x64xf32>
    %180 = vector.broadcast %179 : vector<1x64xf32> to vector<16x64xf32>
    %181 = arith.addf %177, %180 : vector<16x64xf32>
    %c3_108 = arith.constant 3 : index
    %c0_109 = arith.constant 0 : index
    %c0_110 = arith.constant 0 : index
    %182 = vector.load %arg6[%c3_108, %c0_109, %c0_110] : memref<4x256x64xbf16, #tpu.memory_space<vmem>>, vector<1x256x64xbf16>
    %183 = vector.shape_cast %182 : vector<1x256x64xbf16> to vector<256x64xbf16>
    %cst_111 = arith.constant dense<0.000000e+00> : vector<16x64xf32>
    %184 = tpu.matmul %29, %183, %cst_111 {dimension_numbers = #tpu.dot_dimension_numbers<[1], [0], [0], [1], [0, 0, 1, 1], [], []>} : vector<16x256xbf16>, vector<256x64xbf16>, vector<16x64xf32> -> vector<16x64xf32>
    %c3_112 = arith.constant 3 : index
    %c0_113 = arith.constant 0 : index
    %c0_114 = arith.constant 0 : index
    %185 = vector.load %arg9[%c3_112, %c0_113, %c0_114] : memref<4x1x64xf32, #tpu.memory_space<vmem>>, vector<1x1x64xf32>
    %186 = vector.shape_cast %185 : vector<1x1x64xf32> to vector<1x64xf32>
    %187 = vector.broadcast %186 : vector<1x64xf32> to vector<16x64xf32>
    %188 = arith.addf %184, %187 : vector<16x64xf32>
    %c3_115 = arith.constant 3 : index
    %c0_116 = arith.constant 0 : index
    %c0_117 = arith.constant 0 : index
    %189 = vector.load %arg7[%c3_115, %c0_116, %c0_117] : memref<4x256x64xbf16, #tpu.memory_space<vmem>>, vector<1x256x64xbf16>
    %190 = vector.shape_cast %189 : vector<1x256x64xbf16> to vector<256x64xbf16>
    %cst_118 = arith.constant dense<0.000000e+00> : vector<16x64xf32>
    %191 = tpu.matmul %29, %190, %cst_118 {dimension_numbers = #tpu.dot_dimension_numbers<[1], [0], [0], [1], [0, 0, 1, 1], [], []>} : vector<16x256xbf16>, vector<256x64xbf16>, vector<16x64xf32> -> vector<16x64xf32>
    %c3_119 = arith.constant 3 : index
    %c0_120 = arith.constant 0 : index
    %c0_121 = arith.constant 0 : index
    %192 = vector.load %arg10[%c3_119, %c0_120, %c0_121] : memref<4x1x64xf32, #tpu.memory_space<vmem>>, vector<1x1x64xf32>
    %193 = vector.shape_cast %192 : vector<1x1x64xf32> to vector<1x64xf32>
    %194 = vector.broadcast %193 : vector<1x64xf32> to vector<16x64xf32>
    %195 = arith.addf %191, %194 : vector<16x64xf32>
    %196 = vector.shape_cast %181 : vector<16x64xf32> to vector<2x8x64xf32>
    %197 = arith.truncf %196 : vector<2x8x64xf32> to vector<2x8x64xbf16>
    %198 = vector.shape_cast %188 : vector<16x64xf32> to vector<2x8x64xf32>
    %199 = arith.truncf %198 : vector<2x8x64xf32> to vector<2x8x64xbf16>
    %200 = vector.shape_cast %195 : vector<16x64xf32> to vector<2x8x64xf32>
    %201 = arith.truncf %200 : vector<2x8x64xf32> to vector<2x8x64xbf16>
    "tpu.trace_start"() <{level = 10 : i32, message = "bqd,bkd->bqk"}> : () -> ()
    %cst_122 = arith.constant dense<0.000000e+00> : vector<2x8x8xf32>
    %202 = tpu.matmul %197, %199, %cst_122 {dimension_numbers = #tpu.dot_dimension_numbers<[2], [2], [1], [1], [0, 0, 0, 1, 1, 1], [0], [0]>} : vector<2x8x64xbf16>, vector<2x8x64xbf16>, vector<2x8x8xf32> -> vector<2x8x8xf32>
    "tpu.trace_stop"() : () -> ()
    %cst_123 = arith.constant 1.250000e-01 : f32
    %203 = vector.broadcast %cst_123 : f32 to vector<2x8x8xf32>
    %204 = arith.mulf %202, %203 : vector<2x8x8xf32>
    %cst_124 = arith.constant dense<0xFF800000> : vector<2x8xf32>
    %205 = vector.multi_reduction <maximumf>, %204, %cst_124 [2] : vector<2x8x8xf32> to vector<2x8xf32>
    %206 = vector.shape_cast %205 : vector<2x8xf32> to vector<2x8x1xf32>
    %207 = vector.broadcast %206 : vector<2x8x1xf32> to vector<2x8x8xf32>
    %208 = arith.subf %204, %207 : vector<2x8x8xf32>
    %209 = math.exp %208 : vector<2x8x8xf32>
    %cst_125 = arith.constant dense<0.000000e+00> : vector<2x8xf32>
    %210 = vector.multi_reduction <add>, %209, %cst_125 [2] : vector<2x8x8xf32> to vector<2x8xf32>
    %211 = vector.shape_cast %210 : vector<2x8xf32> to vector<2x8x1xf32>
    %212 = tpu.reciprocal %211 {approx = true} : vector<2x8x1xf32> -> vector<2x8x1xf32>
    %213 = vector.broadcast %212 : vector<2x8x1xf32> to vector<2x8x8xf32>
    %214 = arith.mulf %209, %213 : vector<2x8x8xf32>
    %215 = arith.truncf %214 : vector<2x8x8xf32> to vector<2x8x8xbf16>
    "tpu.trace_start"() <{level = 10 : i32, message = "bqk,bkd->bqd"}> : () -> ()
    %cst_126 = arith.constant dense<0.000000e+00> : vector<2x8x64xf32>
    %216 = tpu.matmul %215, %201, %cst_126 {dimension_numbers = #tpu.dot_dimension_numbers<[2], [1], [1], [2], [0, 0, 0, 1, 1, 2], [0], [0]>} : vector<2x8x8xbf16>, vector<2x8x64xbf16>, vector<2x8x64xf32> -> vector<2x8x64xf32>
    "tpu.trace_stop"() : () -> ()
    %217 = vector.shape_cast %216 : vector<2x8x64xf32> to vector<16x64xf32>
    %218 = arith.truncf %217 : vector<16x64xf32> to vector<16x64xbf16>
    %c3_127 = arith.constant 3 : index
    %c0_128 = arith.constant 0 : index
    %c0_129 = arith.constant 0 : index
    %219 = vector.load %arg11[%c3_127, %c0_128, %c0_129] : memref<4x64x256xbf16, #tpu.memory_space<vmem>>, vector<1x64x256xbf16>
    %220 = vector.shape_cast %219 : vector<1x64x256xbf16> to vector<64x256xbf16>
    %cst_130 = arith.constant dense<0.000000e+00> : vector<16x256xf32>
    %221 = tpu.matmul %218, %220, %cst_130 {dimension_numbers = #tpu.dot_dimension_numbers<[1], [0], [0], [1], [0, 0, 1, 1], [], []>} : vector<16x64xbf16>, vector<64x256xbf16>, vector<16x256xf32> -> vector<16x256xf32>
    %222 = arith.addf %174, %221 : vector<16x256xf32>
    %c0_131 = arith.constant 0 : index
    %c0_132 = arith.constant 0 : index
    %223 = vector.load %arg12[%c0_131, %c0_132] : memref<1x256xf32, #tpu.memory_space<vmem>>, vector<1x256xf32>
    %224 = vector.broadcast %223 : vector<1x256xf32> to vector<16x256xf32>
    %225 = arith.addf %222, %224 : vector<16x256xf32>
    %226 = vector.shape_cast %225 : vector<16x256xf32> to vector<2x8x256xf32>
    %c0_133 = arith.constant 0 : index
    %c0_134 = arith.constant 0 : index
    %c0_135 = arith.constant 0 : index
    %227 = vector.load %arg13[%c0_133, %c0_134, %c0_135] : memref<2x8x256xf32, #tpu.memory_space<vmem>>, vector<2x8x256xf32>
    tpu.vector_store %arg13[%c0_133, %c0_134, %c0_135], %226 {strides = array<i32>} : memref<2x8x256xf32, #tpu.memory_space<vmem>>, vector<2x8x256xf32>,
    return
  }
  func.func @transform_0(%arg0: i32) -> (i32, i32, i32) {
    %c0_i32 = arith.constant 0 : i32
    %c0_i32_0 = arith.constant 0 : i32
    %c0_i32_1 = arith.constant 0 : i32
    return %arg0, %c0_i32, %c0_i32_0 : i32, i32, i32
  }
  func.func @transform_1(%arg0: i32) -> (i32, i32, i32) {
    %c0_i32 = arith.constant 0 : i32
    %c0_i32_0 = arith.constant 0 : i32
    %c0_i32_1 = arith.constant 0 : i32
    return %arg0, %c0_i32, %c0_i32_0 : i32, i32, i32
  }
  func.func @transform_2(%arg0: i32) -> (i32, i32) {
    %c0_i32 = arith.constant 0 : i32
    %c0_i32_0 = arith.constant 0 : i32
    %c0_i32_1 = arith.constant 0 : i32
    return %c0_i32, %c0_i32_0 : i32, i32
  }
  func.func @transform_3(%arg0: i32) -> (i32, i32) {
    %c0_i32 = arith.constant 0 : i32
    %c0_i32_0 = arith.constant 0 : i32
    %c0_i32_1 = arith.constant 0 : i32
    return %c0_i32, %c0_i32_0 : i32, i32
  }
  func.func @transform_4(%arg0: i32) -> (i32, i32, i32) {
    %c0_i32 = arith.constant 0 : i32
    %c0_i32_0 = arith.constant 0 : i32
    %c0_i32_1 = arith.constant 0 : i32
    %c0_i32_2 = arith.constant 0 : i32
    return %c0_i32, %c0_i32_0, %c0_i32_1 : i32, i32, i32
  }
  func.func @transform_5(%arg0: i32) -> (i32, i32, i32) {
    %c0_i32 = arith.constant 0 : i32
    %c0_i32_0 = arith.constant 0 : i32
    %c0_i32_1 = arith.constant 0 : i32
    %c0_i32_2 = arith.constant 0 : i32
    return %c0_i32, %c0_i32_0, %c0_i32_1 : i32, i32, i32
  }
  func.func @transform_6(%arg0: i32) -> (i32, i32, i32) {
    %c0_i32 = arith.constant 0 : i32
    %c0_i32_0 = arith.constant 0 : i32
    %c0_i32_1 = arith.constant 0 : i32
    %c0_i32_2 = arith.constant 0 : i32
    return %c0_i32, %c0_i32_0, %c0_i32_1 : i32, i32, i32
  }
  func.func @transform_7(%arg0: i32) -> (i32, i32, i32) {
    %c0_i32 = arith.constant 0 : i32
    %c0_i32_0 = arith.constant 0 : i32
    %c0_i32_1 = arith.constant 0 : i32
    %c0_i32_2 = arith.constant 0 : i32
    return %c0_i32, %c0_i32_0, %c0_i32_1 : i32, i32, i32
  }
  func.func @transform_8(%arg0: i32) -> (i32, i32, i32) {
    %c0_i32 = arith.constant 0 : i32
    %c0_i32_0 = arith.constant 0 : i32
    %c0_i32_1 = arith.constant 0 : i32
    %c0_i32_2 = arith.constant 0 : i32
    return %c0_i32, %c0_i32_0, %c0_i32_1 : i32, i32, i32
  }
  func.func @transform_9(%arg0: i32) -> (i32, i32, i32) {
    %c0_i32 = arith.constant 0 : i32
    %c0_i32_0 = arith.constant 0 : i32
    %c0_i32_1 = arith.constant 0 : i32
    %c0_i32_2 = arith.constant 0 : i32
    return %c0_i32, %c0_i32_0, %c0_i32_1 : i32, i32, i32
  }
  func.func @transform_10(%arg0: i32) -> (i32, i32, i32) {
    %c0_i32 = arith.constant 0 : i32
    %c0_i32_0 = arith.constant 0 : i32
    %c0_i32_1 = arith.constant 0 : i32
    %c0_i32_2 = arith.constant 0 : i32
    return %c0_i32, %c0_i32_0, %c0_i32_1 : i32, i32, i32
  }
  func.func @transform_11(%arg0: i32) -> (i32, i32) {
    %c0_i32 = arith.constant 0 : i32
    %c0_i32_0 = arith.constant 0 : i32
    %c0_i32_1 = arith.constant 0 : i32
    return %c0_i32, %c0_i32_0 : i32, i32
  }
  func.func @transform_12(%arg0: i32) -> (i32, i32, i32) {
    %c0_i32 = arith.constant 0 : i32
    %c0_i32_0 = arith.constant 0 : i32
    %c0_i32_1 = arith.constant 0 : i32
    return %arg0, %c0_i32, %c0_i32_0 : i32, i32, i32
  }
}

</mosaic_0001>

<bundles_post_ra>
// kernel: tpu_custom_call.1
= control target key start
LH: loop header
LB: loop body
LE: loop exit
PB: predicated region body
PF: predicated region fallthrough
CT: control target
= control target key end

     0   :  { %v51_v0 = vlaneseq  ;;  %s5863_s0 = inlined_call_operand.vmem [shape: f32[2,8,256], index: 0, kind: input, shape index: {}]   ;;  %s5864_s1 = inlined_call_operand.vmem [shape: f32[2,1,256], index: 1, kind: input, shape index: {}]   ;;  %s5865_s2 = inlined_call_operand.vmem [shape: f32[1,256], index: 2, kind: input, shape index: {}]   ;;  %s5866_s3 = inlined_call_operand.vmem [shape: f32[1,256], index: 3, kind: input, shape index: {}]   ;;  %s5867_s4 = inlined_call_operand.vmem [shape: bf16[4,256,64], index: 4, kind: input, shape index: {}]   ;;  %s5868_s5 = inlined_call_operand.vmem [shape: bf16[4,256,64], index: 5, kind: input, shape index: {}]   ;;  %s5869_s6 = inlined_call_operand.vmem [shape: bf16[4,256,64], index: 6, kind: input, shape index: {}]   ;;  %s5870_s7 = inlined_call_operand.vmem [shape: f32[4,1,64], index: 7, kind: input, shape index: {}]   ;;  %s5871_s8 = inlined_call_operand.vmem [shape: f32[4,1,64], index: 8, kind: input, shape index: {}]   ;;  %s5872_s9 = inlined_call_operand.vmem [shape: f32[4,1,64], index: 9, kind: input, shape index: {}]   ;;  %s5873_s10 = inlined_call_operand.vmem [shape: bf16[4,64,256], index: 10, kind: input, shape index: {}]   ;;  %s5874_s11 = inlined_call_operand.vmem [shape: f32[1,256], index: 11, kind: input, shape index: {}]   ;;  %s5875_s12 = inlined_call_operand.hbm [shape: f32[2,8,256], index: 12, kind: output, shape index: {}]  }
   0x1   :  { %v47_v1 = vld [vmem:[%s5864_s1] sm:$0x3]  ;;  %v48_v2 = vld [vmem:[%s5864_s1 + $0x2] sm:$0x3]  ;;  %v44_v5 = vld [vmem:[%s5863_s0 + $0x8] sm:$0xff] }
   0x2   :  { %v52_v3 = vshrl.u32 %v51_v0, 7  ;;  %v43_v4 = vld [vmem:[%s5863_s0] sm:$0xff]  ;;  %v45_v6 = vld [vmem:[%s5863_s0 + $0x10] sm:$0xff]  ;;  %v46_v7 = vld [vmem:[%s5863_s0 + $0x18] sm:$0xff] }
   0x3   :  { %v4553_v20 = vld [vmem:[%s5867_s4 + $0x40] sm:$0xff]   ;;  %v4557_v24 = vld [vmem:[%s5867_s4 + $0x48] sm:$0xff]  }
   0x4   :  { %v4942_v8 = vsub.s32 0, %v52_v3  ;;  %v4944_v9 = vsub.s32 1, %v52_v3  ;;  %v4554_v21 = vld [vmem:[%s5867_s4] sm:$0xff]   ;;  %4143 = vmatprep.subr.bf16.mxu0 %v4553_v20 }
   0x5   :  { %v4555_v22 = vld [vmem:[%s5868_s5 + $0x40] sm:$0xff]   ;;  %4144 = vmatpush3.bf16.msra.mxu0 %v4554_v21 }
   0x6   :  { %v54_v10 = vrot.slane %v47_v1, %v4942_v8  ;;  %v58_v11 = vrot.slane %v47_v1, %v4944_v9  ;;  %v62_v12 = vrot.slane %v48_v2, %v4942_v8  ;;  %v66_v13 = vrot.slane %v48_v2, %v4944_v9  ;;  %v4556_v23 = vld [vmem:[%s5868_s5] sm:$0xff]   ;;  %4165 = vmatprep.subr.bf16.mxu1 %v4555_v22 }
   0x7   :  { %4166 = vmatpush3.bf16.msra.mxu1 %v4556_v23  ;;  %4145 = vmatprep.subr.bf16.mxu0 %v4557_v24 }
   0x8   :  { %v71_v14 = vmul.f32 %v54_v10, %v43_v4  ;;  %v72_v15 = vmul.f32 %v58_v11, %v44_v5  ;;  %v73_v16 = vmul.f32 %v62_v12, %v45_v6  ;;  %v74_v17 = vmul.f32 %v66_v13, %v46_v7 }
   0xa   :  { %v75_v18 = vadd.f32 %v72_v15, %v71_v14  ;;  %v78_v19 = vadd.f32 %v74_v17, %v73_v16 }
   0xc   :  { %76 = vadd.xlane.f32.xlu0 %v75_v18 }
  0x10   :  { %79 = vadd.xlane.f32.xlu0 %v78_v19 }
  0x11   :  { %17 = vsyncpa [#allocation3], 0  ;;  %v4558_v39 = vld [vmem:[%s5867_s4 + $0x8] sm:$0xff]   ;;  %v4561_v42 = vld [vmem:[%s5867_s4 + $0x50] sm:$0xff]   ;;  %vm4854_vm0 = vmmov 0   ;;  %vm676_vm1 = vcmask 523264  }
  0x12   :  { %v4559_v40 = vld [vmem:[%s5868_s5 + $0x48] sm:$0xff]   ;;  %4146 = vmatpush3.bf16.msra.mxu0 %v4558_v39  ;;  %v4562_v43 = vld [vmem:[%s5867_s4 + $0x10] sm:$0xff]   ;;  %v4565_v46 = vld [vmem:[%s5867_s4 + $0x58] sm:$0xff]   ;;  %vm799_vm2 = vcmask 1043456   ;;  %vm771_vm3 = vcmask 64512  }
  0x13   :  { %v4560_v41 = vld [vmem:[%s5868_s5 + $0x8] sm:$0xff]   ;;  %4167 = vmatprep.subr.bf16.mxu1 %v4559_v40  ;;  %v4563_v44 = vld [vmem:[%s5868_s5 + $0x50] sm:$0xff]   ;;  %4147 = vmatprep.subr.bf16.mxu0 %v4561_v42  ;;  %v4566_v47 = vld [vmem:[%s5867_s4 + $0x18] sm:$0xff]  }
  0x14   :  { %4168 = vmatpush3.bf16.msra.mxu1 %v4560_v41  ;;  %v4564_v45 = vld [vmem:[%s5868_s5 + $0x10] sm:$0xff]   ;;  %v4567_v48 = vld [vmem:[%s5868_s5 + $0x58] sm:$0xff]   ;;  %v4569_v50 = vld [vmem:[%s5867_s4 + $0x60] sm:$0xff]  }
  0x15   :  { %4169 = vmatprep.subr.bf16.mxu1 %v4563_v44  ;;  %v4568_v49 = vld [vmem:[%s5868_s5 + $0x18] sm:$0xff]   ;;  %v4570_v51 = vld [vmem:[%s5867_s4 + $0x20] sm:$0xff]   ;;  %v4573_v54 = vld [vmem:[%s5867_s4 + $0x68] sm:$0xff]  }
  0x16   :  { %4148 = vmatpush3.bf16.msra.mxu0 %v4562_v43  ;;  %v4571_v52 = vld [vmem:[%s5868_s5 + $0x60] sm:$0xff]   ;;  %v4574_v55 = vld [vmem:[%s5867_s4 + $0x28] sm:$0xff]   ;;  %v4577_v58 = vld [vmem:[%s5867_s4 + $0x70] sm:$0xff]  }
  0x17   :  { %4149 = vmatprep.subr.bf16.mxu0 %v4565_v46  ;;  %v4572_v53 = vld [vmem:[%s5868_s5 + $0x20] sm:$0xff]   ;;  %v4575_v56 = vld [vmem:[%s5868_s5 + $0x68] sm:$0xff]   ;;  %v4578_v59 = vld [vmem:[%s5867_s4 + $0x30] sm:$0xff]  }
  0x18   :  { %4170 = vmatpush3.bf16.msra.mxu1 %v4564_v45  ;;  %v4576_v57 = vld [vmem:[%s5868_s5 + $0x28] sm:$0xff]   ;;  %v4579_v60 = vld [vmem:[%s5868_s5 + $0x70] sm:$0xff]   ;;  %v4581_v62 = vld [vmem:[%s5867_s4 + $0x78] sm:$0xff]  }
  0x19   :  { %4171 = vmatprep.subr.bf16.mxu1 %v4567_v48  ;;  %v4580_v61 = vld [vmem:[%s5868_s5 + $0x30] sm:$0xff]   ;;  %v4582_v63 = vld [vmem:[%s5867_s4 + $0x38] sm:$0xff]   ;;  %v4585_v2 = vld [vmem:[%s5869_s6 + $0x40] sm:$0xff]  }
  0x1a   :  { %4150 = vmatpush3.bf16.msra.mxu0 %v4566_v47  ;;  %v4583_v0 = vld [vmem:[%s5868_s5 + $0x78] sm:$0xff]   ;;  %v108_v11 = vld [vmem:[%s5865_s2] sm:$0x3]  ;;  %v4595_v42 = vld [vmem:[%s5869_s6 + $0x68] sm:$0xff]  }
  0x1b   :  { %4151 = vmatprep.subr.bf16.mxu0 %v4569_v50  ;;  %v4584_v1 = vld [vmem:[%s5868_s5 + $0x38] sm:$0xff]   ;;  %v113_v13 = vrot.slane %v108_v11, %v4942_v8  ;;  %v4593_v40 = vld [vmem:[%s5869_s6 + $0x60] sm:$0xff]   ;;  %v4596_v43 = vld [vmem:[%s5869_s6 + $0x28] sm:$0xff]  }
  0x1c   :  { %4172 = vmatpush3.bf16.msra.mxu1 %v4568_v49  ;;  %v4592_v39 = vld [vmem:[%s5869_s6 + $0x18] sm:$0xff]   ;;  %v4594_v41 = vld [vmem:[%s5869_s6 + $0x20] sm:$0xff]   ;;  %v4597_v44 = vld [vmem:[%s5869_s6 + $0x70] sm:$0xff]  }
  0x1d   :  { %4173 = vmatprep.subr.bf16.mxu1 %v4571_v52  ;;  %v4598_v45 = vld [vmem:[%s5869_s6 + $0x30] sm:$0xff]   ;;  %v4599_v46 = vld [vmem:[%s5869_s6 + $0x78] sm:$0xff]   ;;  %v4601_v48 = vld [vmem:[%s5867_s4 + $0xc0] sm:$0xff]  }
  0x1e   :  { %4152 = vmatpush3.bf16.msra.mxu0 %v4570_v51  ;;  %v4600_v47 = vld [vmem:[%s5869_s6 + $0x38] sm:$0xff]   ;;  %v4602_v49 = vld [vmem:[%s5867_s4 + $0x80] sm:$0xff]   ;;  %v4603_v50 = vld [vmem:[%s5867_s4 + $0xc8] sm:$0xff]  }
  0x1f   :  { %4153 = vmatprep.subr.bf16.mxu0 %v4573_v54  ;;  %v4604_v51 = vld [vmem:[%s5867_s4 + $0x88] sm:$0xff]   ;;  %v4605_v52 = vld [vmem:[%s5867_s4 + $0xd0] sm:$0xff]   ;;  %v4607_v54 = vld [vmem:[%s5867_s4 + $0xd8] sm:$0xff]  }
  0x20   :  { %4174 = vmatpush3.bf16.msra.mxu1 %v4572_v53  ;;  %v4606_v53 = vld [vmem:[%s5867_s4 + $0x90] sm:$0xff]  }
  0x21   :  { %4175 = vmatprep.subr.bf16.mxu1 %v4575_v56  ;;  %v4609_v56 = vld [vmem:[%s5867_s4 + $0xe0] sm:$0xff]  }
  0x22   :  { %4154 = vmatpush3.bf16.msra.mxu0 %v4574_v55  ;;  %v4608_v55 = vld [vmem:[%s5867_s4 + $0x98] sm:$0xff]  }
  0x23   :  { %4155 = vmatprep.subr.bf16.mxu0 %v4577_v58  ;;  %v4611_v58 = vld [vmem:[%s5867_s4 + $0xe8] sm:$0xff]  }
  0x24   :  { %4176 = vmatpush3.bf16.msra.mxu1 %v4576_v57  ;;  %v4610_v57 = vld [vmem:[%s5867_s4 + $0xa0] sm:$0xff]  }
  0x25   :  { %4177 = vmatprep.subr.bf16.mxu1 %v4579_v60  ;;  %v4613_v60 = vld [vmem:[%s5867_s4 + $0xf0] sm:$0xff]  }
  0x26   :  { %4156 = vmatpush3.bf16.msra.mxu0 %v4578_v59  ;;  %v4612_v59 = vld [vmem:[%s5867_s4 + $0xa8] sm:$0xff]  }
  0x27   :  { %4157 = vmatprep.subr.bf16.mxu0 %v4581_v62  ;;  %v4615_v62 = vld [vmem:[%s5867_s4 + $0xf8] sm:$0xff]  }
  0x28   :  { %4178 = vmatpush3.bf16.msra.mxu1 %v4580_v61  ;;  %v4614_v61 = vld [vmem:[%s5867_s4 + $0xb0] sm:$0xff]  }
  0x29   :  { %4179 = vmatprep.subr.bf16.mxu1 %v4583_v0  ;;  %v4617_v0 = vld [vmem:[%s5869_s6 + $0xc0] sm:$0xff]  }
  0x2a   :  { %4158 = vmatpush3.bf16.msra.mxu0 %v4582_v63  ;;  %v4616_v63 = vld [vmem:[%s5867_s4 + $0xb8] sm:$0xff]  }
  0x2b   :  { %4187 = vmatprep.subr.bf16.mxu0 %v4585_v2  ;;  %v4619_v2 = vld [vmem:[%s5869_s6 + $0xc8] sm:$0xff]  }
  0x2c   :  { %4180 = vmatpush3.bf16.msra.mxu1 %v4584_v1  ;;  %v4618_v1 = vld [vmem:[%s5869_s6 + $0x80] sm:$0xff]  }
  0x99   :  { %v77_v25 = vpop.xlane.xlu0 %76 }
  0x9a   :  { %v82_v26 = vmul.f32 0.00390625, %v77_v25 }
  0x9c   :  { %v4965_v27 = vsub.f32 %v71_v14, %v82_v26  ;;  %v4967_v28 = vsub.f32 %v72_v15, %v82_v26  ;;  %v117_v14 = vrot.slane %v108_v11, %v4944_v9  ;;  %v124_v15 = vld [vmem:[%s5866_s3] sm:$0x3] }
  0x9d   :  { %v80_v29 = vpop.xlane.xlu0 %79  ;;  %v129_v19 = vrot.slane %v124_v15, %v4942_v8  ;;  %v133_v20 = vrot.slane %v124_v15, %v4944_v9  ;;  %v4626_v11 = vld [vmem:[%s5869_s6 + $0xa0] sm:$0xff]   ;;  %v4630_v15 = vld [vmem:[%s5869_s6 + $0xb0] sm:$0xff]  }
  0x9e   :  { %v83_v30 = vmul.f32 0.00390625, %v80_v29  ;;  %v88_v31 = vmul.f32 %v4965_v27, %v4965_v27  ;;  %v89_v32 = vmul.f32 %v4967_v28, %v4967_v28 }
  0xa0   :  { %v4973_v33 = vsub.f32 %v73_v16, %v83_v30  ;;  %v4975_v34 = vsub.f32 %v74_v17, %v83_v30  ;;  %v92_v35 = vadd.f32 %v89_v32, %v88_v31 }
  0xa2   :  { %93 = vadd.xlane.f32.xlu1 %v92_v35  ;;  %v90_v36 = vmul.f32 %v4973_v33, %v4973_v33  ;;  %v91_v37 = vmul.f32 %v4975_v34, %v4975_v34  ;;  %v4586_v35 = vld [vmem:[%s5869_s6] sm:$0xff]  }
  0xa4   :  { %v95_v38 = vadd.f32 %v91_v37, %v90_v36  ;;  %v4589_v36 = vld [vmem:[%s5869_s6 + $0x50] sm:$0xff]  }
  0xa5   :  { %v4590_v37 = vld [vmem:[%s5869_s6 + $0x10] sm:$0xff]  }
  0xa6   :  { %96 = vadd.xlane.f32.xlu1 %v95_v38  ;;  %v4591_v38 = vld [vmem:[%s5869_s6 + $0x58] sm:$0xff]  }
 0x12f   :  { %v94_v3 = vpop.xlane.xlu1 %93 }
 0x130   :  { %v98_v4 = vmul.f32 0.00390625, %v94_v3  ;;  %v4620_v3 = vld [vmem:[%s5869_s6 + $0x88] sm:$0xff]  }
 0x132   :  { %v100_v5 = vadd.f32 1e-05, %v98_v4  ;;  %v4621_v4 = vld [vmem:[%s5869_s6 + $0xd0] sm:$0xff]  }
 0x133   :  { %v97_v6 = vpop.xlane.xlu1 %96 }
 0x134   :  { %4793 = vrsqrt.f32 %v100_v5  ;;  %v99_v7 = vmul.f32 0.00390625, %v97_v6  ;;  %v4622_v5 = vld [vmem:[%s5869_s6 + $0x90] sm:$0xff]   ;;  %v4623_v6 = vld [vmem:[%s5869_s6 + $0xd8] sm:$0xff]  }
 0x136   :  { %v101_v10 = vadd.f32 1e-05, %v99_v7  ;;  %v4624_v7 = vld [vmem:[%s5869_s6 + $0x98] sm:$0xff]  }
 0x138   :  { %4795 = vrsqrt.f32 %v101_v10  ;;  %v4625_v10 = vld [vmem:[%s5869_s6 + $0xe0] sm:$0xff]  }
 0x13e   :  { %v4794_v12 = vpop.eup %4793 }
 0x13f   :  { %v104_v16 = vmul.f32 %v4794_v12, %v4965_v27  ;;  %v105_v17 = vmul.f32 %v4794_v12, %v4967_v28  ;;  %v4627_v12 = vld [vmem:[%s5869_s6 + $0xe8] sm:$0xff]  }
 0x141   :  { %v120_v21 = vmul.f32 %v113_v13, %v104_v16  ;;  %v121_v22 = vmul.f32 %v117_v14, %v105_v17  ;;  %v4631_v16 = vld [vmem:[%s5869_s6 + $0xf8] sm:$0xff]  }
 0x142   :  { %v4796_v18 = vpop.eup %4795  ;;  %v4632_v17 = vld [vmem:[%s5869_s6 + $0xb8] sm:$0xff]  }
 0x143   :  { %v106_v23 = vmul.f32 %v4796_v18, %v4973_v33  ;;  %v107_v24 = vmul.f32 %v4796_v18, %v4975_v34  ;;  %v136_v29 = vadd.f32 %v129_v19, %v120_v21  ;;  %v137_v30 = vadd.f32 %v133_v20, %v121_v22  ;;  %v4587_v33 = vld [vmem:[%s5869_s6 + $0x48] sm:$0xff]   ;;  %v3583_v22 = vld [vmem:[%s5871_s8] ss:$0 sm:$0xff] }
 0x144   :  { %v4588_v34 = vld [vmem:[%s5869_s6 + $0x8] sm:$0xff]   ;;  %v4853_v18 = vmov 0.0  }
 0x145   :  { %v122_v25 = vmul.f32 %v113_v13, %v106_v23  ;;  %v123_v26 = vmul.f32 %v117_v14, %v107_v24  ;;  %v4628_v13 = vld [vmem:[%s5869_s6 + $0xa8] sm:$0xff]   ;;  %v4629_v14 = vld [vmem:[%s5869_s6 + $0xf0] sm:$0xff]   ;;  %4439 = vmatprep.subr.bf16.mxu1 %v4853_v18 }
 0x147   :  { %v138_v31 = vadd.f32 %v129_v19, %v122_v25  ;;  %v139_v32 = vadd.f32 %v133_v20, %v123_v26 }
 0x149   :  { %v5079_v27 = vpack.c.bf16 %v138_v31, %v136_v29  ;;  %v5081_v28 = vpack.c.bf16 %v139_v32, %v137_v30 }
 0x14b   :  { %309 = vmatprep.mubr.bf16.mxu0 %v5081_v28  ;;  %485 = vmatprep.mubr.bf16.mxu1 %v5081_v28 }
 0x14c   :  { %310 = vmatmul.mubr.bf16.vlgmr.msra.gmra.mrb[0].mxu0 %v5079_v27  ;;  %486 = vmatmul.mubr.bf16.vlgmr.msra.gmra.mrb[0].mxu1 %v5079_v27 }
 0x14d   :  { %4188 = vmatpush3.bf16.msra.mxu0 %v4586_v35  ;;  %661 = vmatprep.mubr.bf16.mxu0 %v5081_v28 }
 0x14e   :  { %4189 = vmatprep.subr.bf16.mxu0 %v4587_v33  ;;  %4441 = vmatprep.mubr.msk.bf16.mxu1 %vm4854_vm0, %v4853_v18 }
 0x151   :  { %4190 = vmatpush3.bf16.msra.mxu0 %v4588_v34 }
 0x152   :  { %4191 = vmatprep.subr.bf16.mxu0 %v4589_v36  ;;  %v3566_v36 = vld [vmem:[%s5870_s7] ss:$0 sm:$0xff] }
 0x155   :  { %4192 = vmatpush3.bf16.msra.mxu0 %v4590_v37 }
 0x156   :  { %4193 = vmatprep.subr.bf16.mxu0 %v4591_v38 }
 0x159   :  { %4194 = vmatpush3.bf16.msra.mxu0 %v4592_v39 }
 0x15a   :  { %4195 = vmatprep.subr.bf16.mxu0 %v4593_v40 }
 0x15d   :  { %4196 = vmatpush3.bf16.msra.mxu0 %v4594_v41 }
 0x15e   :  { %4197 = vmatprep.subr.bf16.mxu0 %v4595_v42 }
 0x161   :  { %4198 = vmatpush3.bf16.msra.mxu0 %v4596_v43 }
 0x162   :  { %4199 = vmatprep.subr.bf16.mxu0 %v4597_v44 }
 0x165   :  { %4200 = vmatpush3.bf16.msra.mxu0 %v4598_v45 }
 0x166   :  { %4201 = vmatprep.subr.bf16.mxu0 %v4599_v46  ;;  %v3600_v46 = vld [vmem:[%s5872_s9] ss:$0 sm:$0xff] }
 0x169   :  { %4202 = vmatpush3.bf16.msra.mxu0 %v4600_v47 }
 0x16a   :  { %4217 = vmatprep.subr.bf16.mxu0 %v4601_v48 }
 0x16c   :  { %662 = vmatmul.mubr.bf16.vlgmr.msra.gmra.mrb[4].mxu0 %v5079_v27 }
 0x16d   :  { %4218 = vmatpush3.bf16.msra.mxu0 %v4602_v49  ;;  %1067 = vmatprep.mubr.bf16.mxu0 %v5081_v28 }
 0x16e   :  { %4219 = vmatprep.subr.bf16.mxu0 %v4603_v50 }
 0x171   :  { %4220 = vmatpush3.bf16.msra.mxu0 %v4604_v51 }
 0x172   :  { %4221 = vmatprep.subr.bf16.mxu0 %v4605_v52 }
 0x175   :  { %4222 = vmatpush3.bf16.msra.mxu0 %v4606_v53 }
 0x176   :  { %4223 = vmatprep.subr.bf16.mxu0 %v4607_v54 }
 0x179   :  { %4224 = vmatpush3.bf16.msra.mxu0 %v4608_v55 }
 0x17a   :  { %4225 = vmatprep.subr.bf16.mxu0 %v4609_v56 }
 0x17d   :  { %4226 = vmatpush3.bf16.msra.mxu0 %v4610_v57 }
 0x17e   :  { %4227 = vmatprep.subr.bf16.mxu0 %v4611_v58 }
 0x181   :  { %4228 = vmatpush3.bf16.msra.mxu0 %v4612_v59 }
 0x182   :  { %4229 = vmatprep.subr.bf16.mxu0 %v4613_v60 }
 0x185   :  { %4230 = vmatpush3.bf16.msra.mxu0 %v4614_v61 }
 0x186   :  { %4231 = vmatprep.subr.bf16.mxu0 %v4615_v62 }
 0x189   :  { %4232 = vmatpush3.bf16.msra.mxu0 %v4616_v63 }
 0x18a   :  { %4261 = vmatprep.subr.bf16.mxu0 %v4617_v0 }
 0x18c   :  { %1068 = vmatmul.mubr.bf16.vlgmr.msra.gmra.mrb[8].mxu0 %v5079_v27 }
 0x18d   :  { %4262 = vmatpush3.bf16.msra.mxu0 %v4618_v1  ;;  %1423 = vmatprep.mubr.bf16.mxu0 %v5081_v28 }
 0x18e   :  { %4263 = vmatprep.subr.bf16.mxu0 %v4619_v2 }
 0x191   :  { %4264 = vmatpush3.bf16.msra.mxu0 %v4620_v3 }
 0x192   :  { %4265 = vmatprep.subr.bf16.mxu0 %v4621_v4  ;;  %v5267_v4 = vld [vmem:[%s5872_s9 + $0x1] ss:$0 sm:$0xff] }
 0x195   :  { %4266 = vmatpush3.bf16.msra.mxu0 %v4622_v5 }
 0x196   :  { %4267 = vmatprep.subr.bf16.mxu0 %v4623_v6 }
 0x199   :  { %4268 = vmatpush3.bf16.msra.mxu0 %v4624_v7 }
 0x19a   :  { %4269 = vmatprep.subr.bf16.mxu0 %v4625_v10 }
 0x19d   :  { %4270 = vmatpush3.bf16.msra.mxu0 %v4626_v11 }
 0x19e   :  { %4271 = vmatprep.subr.bf16.mxu0 %v4627_v12 }
 0x1a1   :  { %4272 = vmatpush3.bf16.msra.mxu0 %v4628_v13 }
 0x1a2   :  { %4273 = vmatprep.subr.bf16.mxu0 %v4629_v14 }
 0x1a5   :  { %4274 = vmatpush3.bf16.msra.mxu0 %v4630_v15 }
 0x1a6   :  { %4275 = vmatprep.subr.bf16.mxu0 %v4631_v16 }
 0x1a9   :  { %4276 = vmatpush3.bf16.msra.mxu0 %v4632_v17 }
 0x1ac   :  { %1424 = vmatmul.mubr.bf16.vlgmr.msra.gmra.mrb[12].mxu0 %v5079_v27 }
 0x21f   :  { %v4159_v19 = vpop.f32.mrb[0].mxu0  ;;  %v4181_v20 = vpop.f32.mrb[0].mxu1 }
 0x220   :  { %v4160_v21 = vpop.f32.mrb[1].mxu0  ;;  %v4182_v23 = vpop.f32.mrb[1].mxu1 }
 0x221   :  { %v4161_v24 = vadd.f32 %v4160_v21, %v4159_v19  ;;  %v4183_v25 = vadd.f32 %v4182_v23, %v4181_v20  ;;  %v4162_v26 = vpop.f32.mrb[2].mxu0  ;;  %v4184_v29 = vpop.f32.mrb[2].mxu1 }
 0x222   :  { %v4163_v30 = vpop.f32.mrb[3].mxu0  ;;  %v4185_v31 = vpop.f32.mrb[3].mxu1 }
 0x223   :  { %v488_v32 = vadd.f32 %v4183_v25, %v3583_v22  ;;  %v4164_v35 = vadd.f32 %v4163_v30, %v4162_v26  ;;  %v4186_v33 = vadd.f32 %v4185_v31, %v4184_v29  ;;  %v312_v39 = vadd.f32 %v4161_v24, %v3566_v36 }
 0x225   :  { %v672_v34 = vpack.c.bf16 %v488_v32, %v488_v32  ;;  %v491_v37 = vadd.f32 %v4186_v33, %v3583_v22  ;;  %v670_v41 = vpack.c.bf16 %v312_v39, %v312_v39  ;;  %v315_v43 = vadd.f32 %v4164_v35, %v3566_v36  ;;  %v4633_v39 = vld [vmem:[%s5868_s5 + $0xc0] sm:$0xff]  }
 0x227   :  { %v681_v38 = vsel %vm676_vm1, %v672_v34, 0  ;;  %v673_v40 = vpack.c.bf16 %v491_v37, %v491_v37  ;;  %v671_v44 = vpack.c.bf16 %v315_v43, %v315_v43  ;;  %v4634_v43 = vld [vmem:[%s5868_s5 + $0x80] sm:$0xff]  }
 0x228   :  { %4440 = vmatpush3.bf16.xpose.msra.mxu1 %v681_v38 }
 0x229   :  { %4445 = vmatprep.subr.bf16.mxu1 %v4853_v18  ;;  %v727_v42 = vsel %vm676_vm1, %v673_v40, 0 }
 0x22f   :  { %4442 = vmatmul.mubr.msk.bf16.vlgmr.msra.gmra.mrb[4].mxu1 %vm676_vm1, %v670_v41 }
 0x230   :  { %4446 = vmatpush3.bf16.xpose.msra.mxu1 %v727_v42  ;;  %4447 = vmatprep.mubr.msk.bf16.mxu1 %vm4854_vm0, %v4853_v18 }
 0x231   :  { %4451 = vmatprep.subr.bf16.mxu1 %v4853_v18 }
 0x237   :  { %4448 = vmatmul.mubr.msk.bf16.vlgmr.msra.gmra.mrb[8].mxu1 %vm676_vm1, %v671_v44 }
 0x238   :  { %4453 = vmatprep.mubr.msk.bf16.mxu1 %vm4854_vm0, %v4853_v18 }
 0x23f   :  { %v4203_v45 = vpop.f32.mrb[4].mxu0 }
 0x240   :  { %v4204_v47 = vpop.f32.mrb[5].mxu0 }
 0x241   :  { %v4205_v48 = vadd.f32 %v4204_v47, %v4203_v45  ;;  %v4206_v49 = vpop.f32.mrb[6].mxu0  ;;  %v4635_v45 = vld [vmem:[%s5868_s5 + $0xc8] sm:$0xff]   ;;  %v4637_v47 = vld [vmem:[%s5868_s5 + $0xd0] sm:$0xff]  }
 0x242   :  { %v4207_v50 = vpop.f32.mrb[7].mxu0 }
 0x243   :  { %v664_v51 = vadd.f32 %v4205_v48, %v3600_v46  ;;  %v4208_v52 = vadd.f32 %v4207_v50, %v4206_v49  ;;  %v4638_v48 = vld [vmem:[%s5868_s5 + $0x90] sm:$0xff]   ;;  %v4639_v49 = vld [vmem:[%s5868_s5 + $0xd8] sm:$0xff]  }
 0x244   :  { %v4640_v50 = vld [vmem:[%s5868_s5 + $0x98] sm:$0xff]  }
 0x245   :  { %v674_v53 = vpack.c.bf16 %v664_v51, %v664_v51  ;;  %v667_v54 = vadd.f32 %v4208_v52, %v3600_v46  ;;  %v4636_v46 = vld [vmem:[%s5868_s5 + $0x88] sm:$0xff]   ;;  %v4641_v51 = vld [vmem:[%s5868_s5 + $0xe0] sm:$0xff]  }
 0x246   :  { %v4642_v52 = vld [vmem:[%s5868_s5 + $0xa0] sm:$0xff]  }
 0x247   :  { %v801_v55 = vsel %vm799_vm2, %v674_v53, 0  ;;  %v675_v36 = vpack.c.bf16 %v667_v54, %v667_v54  ;;  %v4643_v53 = vld [vmem:[%s5868_s5 + $0xe8] sm:$0xff]  }
 0x248   :  { %4452 = vmatpush3.bf16.msra.mxu1 %v801_v55  ;;  %v4644_v54 = vld [vmem:[%s5868_s5 + $0xa8] sm:$0xff]   ;;  %v4645_v55 = vld [vmem:[%s5868_s5 + $0xf0] sm:$0xff]  }
 0x249   :  { %4457 = vmatprep.subr.bf16.mxu1 %v4853_v18  ;;  %v847_v40 = vsel %vm799_vm2, %v675_v36, 0 }
 0x25f   :  { %v4233_v56 = vpop.f32.mrb[8].mxu0 }
 0x260   :  { %v4234_v57 = vpop.f32.mrb[9].mxu0 }
 0x261   :  { %v5258_v58 = vadd.f32 %v4234_v57, %v4233_v56  ;;  %v4236_v59 = vpop.f32.mrb[10].mxu0  ;;  %v4646_v56 = vld [vmem:[%s5868_s5 + $0xb0] sm:$0xff]   ;;  %v4647_v57 = vld [vmem:[%s5868_s5 + $0xf8] sm:$0xff]  }
 0x262   :  { %v4237_v60 = vpop.f32.mrb[11].mxu0 }
 0x263   :  { %v5260_v61 = vadd.f32 %v4237_v60, %v4236_v59  ;;  %v4648_v59 = vld [vmem:[%s5868_s5 + $0xb8] sm:$0xff]  }
 0x27f   :  { %v4277_v62 = vpop.f32.mrb[12].mxu0 }
 0x280   :  { %v4278_v63 = vpop.f32.mrb[13].mxu0 }
 0x281   :  { %v5262_v0 = vadd.f32 %v4278_v63, %v4277_v62  ;;  %v4280_v1 = vpop.f32.mrb[14].mxu0 }
 0x282   :  { %v4281_v2 = vpop.f32.mrb[15].mxu0 }
 0x283   :  { %v4282_v3 = vadd.f32 %v4281_v2, %v4280_v1 }
 0x285   :  { %v5270_v5 = vadd.f32 %v4282_v3, %v5267_v4 }
 0x302   :  { %v717_v6 = vpop.f32.mrb[4].mxu1 }
 0x303   :  { %v769_v7 = vmul.f32 0.125, %v717_v6  ;;  %v4443_v10 = vpop.f32.mrb[5].mxu1 }
 0x304   :  { %v720_v11 = vpop.f32.mrb[6].mxu1 }
 0x305   :  { %v4444_v12 = vpop.f32.mrb[7].mxu1  ;;  %v772_v13 = vsel %vm771_vm3, %v769_v7, -inf }
 0x306   :  { %773 = vmax.xlane.f32.xlu0 %v772_v13  ;;  %v3704_v12 = vld [vmem:[%s5871_s8 + $0x1] ss:$0 sm:$0xff] }
 0x30a   :  { %v763_v14 = vpop.f32.mrb[8].mxu1 }
 0x30b   :  { %v770_v15 = vmul.f32 0.125, %v763_v14  ;;  %v4449_v16 = vpop.f32.mrb[9].mxu1 }
 0x30c   :  { %v766_v17 = vpop.f32.mrb[10].mxu1 }
 0x30d   :  { %v4450_v19 = vpop.f32.mrb[11].mxu1  ;;  %v775_v20 = vsel %vm771_vm3, %v770_v15, -inf }
 0x30e   :  { %776 = vmax.xlane.f32.xlu1 %v775_v20 }
 0x393   :  { %v774_v21 = vpop.xlane.xlu0 %773 }
 0x394   :  { %v778_v22 = vsub.f32 %v769_v7, %v774_v21  ;;  %v3654_v21 = vld [vmem:[%s5870_s7 + $0x1] ss:$0 sm:$0xff] }
 0x396   :  { %v780_v23 = vmul.f32 1.442695, %v778_v22 }
 0x398   :  { %4797 = vpow2.f32 %v780_v23 }
 0x39b   :  { %v777_v24 = vpop.xlane.xlu1 %776 }
 0x39c   :  { %v779_v25 = vsub.f32 %v770_v15, %v777_v24  ;;  %v1070_v24 = vadd.f32 %v5258_v58, %v3654_v21 }
 0x39e   :  { %v782_v26 = vmul.f32 1.442695, %v779_v25 }
 0x3a0   :  { %4799 = vpow2.f32 %v782_v26  ;;  %v1432_v26 = vpack.c.bf16 %v1070_v24, %v1070_v24  ;;  %v4660_v24 = vld [vmem:[%s5867_s4 + $0x128] sm:$0xff]  }
 0x3a2   :  { %v4798_v29 = vpop.eup %4797 }
 0x3a3   :  { %v784_v30 = vsel %vm771_vm3, %v4798_v29, 0.0 }
 0x3a4   :  { %785 = vadd.xlane.f32.xlu0 %v784_v30 }
 0x3aa   :  { %v4800_v31 = vpop.eup %4799 }
 0x3ab   :  { %v787_v32 = vsel %vm771_vm3, %v4800_v31, 0.0 }
 0x3ac   :  { %788 = vadd.xlane.f32.xlu1 %v787_v32 }
 0x431   :  { %v786_v35 = vpop.xlane.xlu0 %785 }
 0x432   :  { %4801 = vrcp.f32 %v786_v35 }
 0x439   :  { %v789_v33 = vpop.xlane.xlu1 %788 }
 0x43a   :  { %4803 = vrcp.f32 %v789_v33 }
 0x43c   :  { %v4802_v34 = vpop.eup %4801 }
 0x43d   :  { %v792_v37 = vmul.f32 %v4802_v34, %v4798_v29  ;;  %v1426_v29 = vadd.f32 %v5262_v0, %v5267_v4 }
 0x43f   :  { %v794_v38 = vpack.c.bf16 %v792_v37, %v792_v37  ;;  %v1436_v58 = vpack.c.bf16 %v1426_v29, %v1426_v29  ;;  %v4663_v29 = vld [vmem:[%s5867_s4 + $0x178] sm:$0xff]  }
 0x441   :  { %4454 = vmatmul.mubr.msk.bf16.vlgmr.msra.gmra.mrb[12].mxu1 %vm771_vm3, %v794_v38  ;;  %v1560_v35 = vsel %vm799_vm2, %v1436_v58, 0  ;;  %v4666_v58 = vld [vmem:[%s5869_s6 + $0x100] sm:$0xff]  }
 0x442   :  { %4458 = vmatpush3.bf16.msra.mxu1 %v847_v40  ;;  %4459 = vmatprep.mubr.msk.bf16.mxu1 %vm4854_vm0, %v4853_v18 }
 0x443   :  { %4239 = vmatprep.subr.bf16.mxu1 %v4633_v39 }
 0x444   :  { %v4804_v41 = vpop.eup %4803 }
 0x445   :  { %v793_v42 = vmul.f32 %v4804_v41, %v4800_v31  ;;  %v1073_v31 = vadd.f32 %v5260_v61, %v3654_v21  ;;  %v4657_v21 = vld [vmem:[%s5867_s4 + $0x160] sm:$0xff]  }
 0x447   :  { %v795_v44 = vpack.c.bf16 %v793_v42, %v793_v42  ;;  %v1433_v32 = vpack.c.bf16 %v1073_v31, %v1073_v31  ;;  %v4665_v31 = vld [vmem:[%s5869_s6 + $0x140] sm:$0xff]  }
 0x449   :  { %4460 = vmatmul.mubr.msk.bf16.vlgmr.msra.gmra.mrb[16].mxu1 %vm771_vm3, %v795_v44 }
 0x44a   :  { %4240 = vmatpush3.bf16.msra.mxu1 %v4634_v43  ;;  %1245 = vmatprep.mubr.bf16.mxu1 %v5081_v28 }
 0x44b   :  { %4241 = vmatprep.subr.bf16.mxu1 %v4635_v45 }
 0x44e   :  { %4242 = vmatpush3.bf16.msra.mxu1 %v4636_v46 }
 0x44f   :  { %4243 = vmatprep.subr.bf16.mxu1 %v4637_v47 }
 0x452   :  { %4244 = vmatpush3.bf16.msra.mxu1 %v4638_v48 }
 0x453   :  { %4245 = vmatprep.subr.bf16.mxu1 %v4639_v49 }
 0x456   :  { %4246 = vmatpush3.bf16.msra.mxu1 %v4640_v50 }
 0x457   :  { %4247 = vmatprep.subr.bf16.mxu1 %v4641_v51 }
 0x45a   :  { %4248 = vmatpush3.bf16.msra.mxu1 %v4642_v52 }
 0x45b   :  { %4249 = vmatprep.subr.bf16.mxu1 %v4643_v53  ;;  %v4681_v53 = vld [vmem:[%s5873_s10 + $0x40] ss:$8 sps:$4 sm:$0xff]  }
 0x45e   :  { %4250 = vmatpush3.bf16.msra.mxu1 %v4644_v54  ;;  %v4683_v54 = vld [vmem:[%s5873_s10 + $0x44] ss:$8 sps:$4 sm:$0xff]  }
 0x45f   :  { %4251 = vmatprep.subr.bf16.mxu1 %v4645_v55  ;;  %v4686_v55 = vld [vmem:[%s5873_s10 + $0x54] ss:$8 sps:$4 sm:$0xff]   ;;  %1701 = vmatprep.subr.bf16.mxu0 %v4683_v54  ;;  %v4693_v54 = vld [vmem:[%s5873_s10] ss:$8 sps:$4 sm:$0xff]  }
 0x460   :  { %1702 = vmatpush1.bf16.msra.mxu0 %v4681_v53 }
 0x461   :  { %1703 = vmatprep.subr.bf16.mxu0 %v4686_v55 }
 0x462   :  { %4252 = vmatpush3.bf16.msra.mxu1 %v4646_v56  ;;  %v4684_v56 = vld [vmem:[%s5873_s10 + $0x50] ss:$8 sps:$4 sm:$0xff]  }
 0x463   :  { %4253 = vmatprep.subr.bf16.mxu1 %v4647_v57 }
 0x464   :  { %1704 = vmatpush1.bf16.msra.mxu0 %v4684_v56 }
 0x466   :  { %4254 = vmatpush3.bf16.msra.mxu1 %v4648_v59 }
 0x467   :  { %4463 = vmatprep.subr.bf16.mxu1 %v4853_v18 }
 0x469   :  { %1246 = vmatmul.mubr.bf16.vlgmr.msra.gmra.mrb[20].mxu1 %v5079_v27 }
 0x46a   :  { %4465 = vmatprep.mubr.msk.bf16.mxu1 %vm4854_vm0, %v4853_v18 }
 0x514   :  { %v5334_v60 = vpop.f32.mrb[12].mxu1 }
 0x515   :  { %v4455_v62 = vpop.f32.mrb[13].mxu1 }
 0x516   :  { %v840_v63 = vpop.f32.mrb[14].mxu1 }
 0x517   :  { %v4456_v1 = vpop.f32.mrb[15].mxu1  ;;  %v1437_v63 = vpack.c.bf16 %v5270_v5, %v5270_v5  ;;  %v4650_v5 = vld [vmem:[%s5867_s4 + $0x100] sm:$0xff]  }
 0x51c   :  { %v5336_v2 = vpop.f32.mrb[16].mxu1 }
 0x51d   :  { %v889_v3 = vpack.c.bf16 %v5336_v2, %v5334_v60  ;;  %v4461_v6 = vpop.f32.mrb[17].mxu1  ;;  %v4711_v60 = vld [vmem:[%s5868_s5 + $0x158] sm:$0xff]  }
 0x51e   :  { %v886_v7 = vpop.f32.mrb[18].mxu1  ;;  %v4712_v2 = vld [vmem:[%s5868_s5 + $0x118] sm:$0xff]  }
 0x51f   :  { %v4462_v10 = vpop.f32.mrb[19].mxu1  ;;  %v4649_v7 = vld [vmem:[%s5867_s4 + $0x140] sm:$0xff]  }
 0x520   :  { %v1606_v10 = vsel %vm799_vm2, %v1437_v63, 0  ;;  %v4696_v63 = vld [vmem:[%s5873_s10 + $0x10] ss:$8 sps:$4 sm:$0xff]  }
 0x53c   :  { %v4255_v11 = vpop.f32.mrb[20].mxu1 }
 0x53d   :  { %v4256_v13 = vpop.f32.mrb[21].mxu1 }
 0x53e   :  { %v4257_v14 = vadd.f32 %v4256_v13, %v4255_v11  ;;  %v4258_v15 = vpop.f32.mrb[22].mxu1 }
 0x53f   :  { %v4259_v16 = vpop.f32.mrb[23].mxu1 }
 0x540   :  { %v1248_v17 = vadd.f32 %v4257_v14, %v3704_v12  ;;  %v4260_v19 = vadd.f32 %v4259_v16, %v4258_v15  ;;  %v4651_v14 = vld [vmem:[%s5867_s4 + $0x148] sm:$0xff]   ;;  %v4653_v16 = vld [vmem:[%s5867_s4 + $0x150] sm:$0xff]  }
 0x541   :  { %v4652_v15 = vld [vmem:[%s5867_s4 + $0x108] sm:$0xff]  }
 0x542   :  { %v1434_v20 = vpack.c.bf16 %v1248_v17, %v1248_v17  ;;  %v1251_v22 = vadd.f32 %v4260_v19, %v3704_v12  ;;  %v4654_v17 = vld [vmem:[%s5867_s4 + $0x110] sm:$0xff]   ;;  %v4655_v19 = vld [vmem:[%s5867_s4 + $0x158] sm:$0xff]  }
 0x544   :  { %v1442_v23 = vsel %vm676_vm1, %v1434_v20, 0  ;;  %v1435_v25 = vpack.c.bf16 %v1251_v22, %v1251_v22  ;;  %v4656_v20 = vld [vmem:[%s5867_s4 + $0x118] sm:$0xff]   ;;  %v4658_v22 = vld [vmem:[%s5867_s4 + $0x120] sm:$0xff]  }
 0x545   :  { %4464 = vmatpush3.bf16.xpose.msra.mxu1 %v1442_v23  ;;  %v4659_v23 = vld [vmem:[%s5867_s4 + $0x168] sm:$0xff]  }
 0x546   :  { %4469 = vmatprep.subr.bf16.mxu1 %v4853_v18  ;;  %v1488_v30 = vsel %vm676_vm1, %v1435_v25, 0  ;;  %v4661_v25 = vld [vmem:[%s5867_s4 + $0x170] sm:$0xff]  }
 0x54c   :  { %4466 = vmatmul.mubr.msk.bf16.vlgmr.msra.gmra.mrb[24].mxu1 %vm676_vm1, %v1432_v26  ;;  %v4662_v26 = vld [vmem:[%s5867_s4 + $0x130] sm:$0xff]  }
 0x54d   :  { %4470 = vmatpush3.bf16.xpose.msra.mxu1 %v1488_v30  ;;  %4471 = vmatprep.mubr.msk.bf16.mxu1 %vm4854_vm0, %v4853_v18  ;;  %v4664_v30 = vld [vmem:[%s5867_s4 + $0x138] sm:$0xff]  }
 0x54e   :  { %4475 = vmatprep.subr.bf16.mxu1 %v4853_v18 }
 0x554   :  { %4472 = vmatmul.mubr.msk.bf16.vlgmr.msra.gmra.mrb[28].mxu1 %vm676_vm1, %v1433_v32  ;;  %v4667_v32 = vld [vmem:[%s5869_s6 + $0x148] sm:$0xff]  }
 0x555   :  { %4476 = vmatpush3.bf16.msra.mxu1 %v1560_v35  ;;  %4477 = vmatprep.mubr.msk.bf16.mxu1 %vm4854_vm0, %v4853_v18  ;;  %v4668_v35 = vld [vmem:[%s5869_s6 + $0x108] sm:$0xff]  }
 0x556   :  { %4481 = vmatprep.subr.bf16.mxu1 %v4853_v18 }
 0x61f   :  { %v1478_v0 = vpop.f32.mrb[24].mxu1 }
 0x620   :  { %v1530_v4 = vmul.f32 0.125, %v1478_v0  ;;  %v4467_v33 = vpop.f32.mrb[25].mxu1  ;;  %v4669_v0 = vld [vmem:[%s5869_s6 + $0x150] sm:$0xff]  }
 0x621   :  { %v1481_v34 = vpop.f32.mrb[26].mxu1  ;;  %v4671_v33 = vld [vmem:[%s5869_s6 + $0x158] sm:$0xff]  }
 0x622   :  { %v4468_v36 = vpop.f32.mrb[27].mxu1  ;;  %v1532_v61 = vsel %vm771_vm3, %v1530_v4, -inf  ;;  %v4672_v34 = vld [vmem:[%s5869_s6 + $0x118] sm:$0xff]  }
 0x623   :  { %1533 = vmax.xlane.f32.xlu0 %v1532_v61  ;;  %v4673_v36 = vld [vmem:[%s5869_s6 + $0x160] sm:$0xff]  }
 0x624   :  { %v4674_v61 = vld [vmem:[%s5869_s6 + $0x120] sm:$0xff]  }
 0x627   :  { %v1524_v37 = vpop.f32.mrb[28].mxu1 }
 0x628   :  { %v1531_v38 = vmul.f32 0.125, %v1524_v37  ;;  %v4473_v39 = vpop.f32.mrb[29].mxu1  ;;  %v4675_v37 = vld [vmem:[%s5869_s6 + $0x168] sm:$0xff]  }
 0x629   :  { %v1527_v40 = vpop.f32.mrb[30].mxu1  ;;  %v4677_v39 = vld [vmem:[%s5869_s6 + $0x170] sm:$0xff]  }
 0x62a   :  { %v4474_v41 = vpop.f32.mrb[31].mxu1  ;;  %v1535_v42 = vsel %vm771_vm3, %v1531_v38, -inf  ;;  %v4678_v40 = vld [vmem:[%s5869_s6 + $0x130] sm:$0xff]  }
 0x62b   :  { %1536 = vmax.xlane.f32.xlu1 %v1535_v42  ;;  %v4679_v41 = vld [vmem:[%s5869_s6 + $0x178] sm:$0xff]  }
 0x62c   :  { %v4680_v42 = vld [vmem:[%s5869_s6 + $0x138] sm:$0xff]  }
 0x6b0   :  { %v1534_v43 = vpop.xlane.xlu0 %1533 }
 0x6b1   :  { %v1538_v44 = vsub.f32 %v1530_v4, %v1534_v43  ;;  %v4670_v4 = vld [vmem:[%s5869_s6 + $0x110] sm:$0xff]   ;;  %v4689_v43 = vld [vmem:[%s5873_s10 + $0x64] ss:$8 sps:$4 sm:$0xff]  }
 0x6b2   :  { %1705 = vmatprep.subr.bf16.mxu0 %v4689_v43 }
 0x6b3   :  { %v1540_v45 = vmul.f32 1.442695, %v1538_v44  ;;  %v4687_v44 = vld [vmem:[%s5873_s10 + $0x60] ss:$8 sps:$4 sm:$0xff]  }
 0x6b4   :  { %1706 = vmatpush1.bf16.msra.mxu0 %v4687_v44 }
 0x6b5   :  { %4805 = vpow2.f32 %v1540_v45  ;;  %v4692_v45 = vld [vmem:[%s5873_s10 + $0x74] ss:$8 sps:$4 sm:$0xff]  }
 0x6b6   :  { %1707 = vmatprep.subr.bf16.mxu0 %v4692_v45 }
 0x6b8   :  { %v1537_v46 = vpop.xlane.xlu1 %1536 }
 0x6b9   :  { %v1539_v47 = vsub.f32 %v1531_v38, %v1537_v46  ;;  %v4676_v38 = vld [vmem:[%s5869_s6 + $0x128] sm:$0xff]   ;;  %v4690_v46 = vld [vmem:[%s5873_s10 + $0x70] ss:$8 sps:$4 sm:$0xff]  }
 0x6ba   :  { %1708 = vmatpush1.bf16.msra.mxu0 %v4690_v46 }
 0x6bb   :  { %v1542_v48 = vmul.f32 1.442695, %v1539_v47  ;;  %v4695_v47 = vld [vmem:[%s5873_s10 + $0x4] ss:$8 sps:$4 sm:$0xff]  }
 0x6bc   :  { %1787 = vmatprep.subr.bf16.mxu0 %v4695_v47 }
 0x6bd   :  { %4807 = vpow2.f32 %v1542_v48  ;;  %v4855_v48 = vmov 0  }
 0x6be   :  { %1733 = vmatprep.mubr.bf16.mxu0 %v4855_v48 }
 0x6bf   :  { %v4806_v49 = vpop.eup %4805 }
 0x6c0   :  { %v1544_v50 = vsel %vm771_vm3, %v4806_v49, 0.0 }
 0x6c1   :  { %1545 = vadd.xlane.f32.xlu0 %v1544_v50 }
 0x6c7   :  { %v4808_v51 = vpop.eup %4807 }
 0x6c8   :  { %v1547_v52 = vsel %vm771_vm3, %v4808_v51, 0.0 }
 0x6c9   :  { %1548 = vadd.xlane.f32.xlu1 %v1547_v52 }
 0x74e   :  { %v1546_v57 = vpop.xlane.xlu0 %1545 }
 0x74f   :  { %4809 = vrcp.f32 %v1546_v57  ;;  %v4698_v57 = vld [vmem:[%s5873_s10 + $0x14] ss:$8 sps:$4 sm:$0xff]  }
 0x756   :  { %v1549_v59 = vpop.xlane.xlu1 %1548 }
 0x757   :  { %4811 = vrcp.f32 %v1549_v59 }
 0x759   :  { %v4810_v62 = vpop.eup %4809 }
 0x75a   :  { %v1552_v1 = vmul.f32 %v4810_v62, %v4806_v49 }
 0x75c   :  { %v1554_v6 = vpack.c.bf16 %v1552_v1, %v1552_v1  ;;  %v4701_v1 = vld [vmem:[%s5873_s10 + $0x24] ss:$8 sps:$4 sm:$0xff]  }
 0x75e   :  { %4478 = vmatmul.mubr.msk.bf16.vlgmr.msra.gmra.mrb[32].mxu1 %vm771_vm3, %v1554_v6  ;;  %v4699_v6 = vld [vmem:[%s5873_s10 + $0x20] ss:$8 sps:$4 sm:$0xff]  }
 0x75f   :  { %4482 = vmatpush3.bf16.msra.mxu1 %v1606_v10  ;;  %4483 = vmatprep.mubr.msk.bf16.mxu1 %vm4854_vm0, %v4853_v18  ;;  %v4702_v10 = vld [vmem:[%s5873_s10 + $0x30] ss:$8 sps:$4 sm:$0xff]  }
 0x760   :  { %4291 = vmatprep.subr.bf16.mxu1 %v4649_v7  ;;  %v4704_v7 = vld [vmem:[%s5873_s10 + $0x34] ss:$8 sps:$4 sm:$0xff]  }
 0x761   :  { %v4812_v11 = vpop.eup %4811 }
 0x762   :  { %v1553_v12 = vmul.f32 %v4812_v11, %v4808_v51  ;;  %v4705_v11 = vld [vmem:[%s5868_s5 + $0x140] sm:$0xff]  }
 0x764   :  { %v1555_v13 = vpack.c.bf16 %v1553_v12, %v1553_v12  ;;  %v4706_v12 = vld [vmem:[%s5868_s5 + $0x100] sm:$0xff]  }
 0x766   :  { %4484 = vmatmul.mubr.msk.bf16.vlgmr.msra.gmra.mrb[36].mxu1 %vm771_vm3, %v1555_v13  ;;  %v4708_v13 = vld [vmem:[%s5868_s5 + $0x108] sm:$0xff]  }
 0x767   :  { %4292 = vmatpush3.bf16.msra.mxu1 %v4650_v5  ;;  %1999 = vmatprep.mubr.bf16.mxu1 %v5081_v28  ;;  %v4707_v5 = vld [vmem:[%s5868_s5 + $0x148] sm:$0xff]  }
 0x768   :  { %4293 = vmatprep.subr.bf16.mxu1 %v4651_v14  ;;  %v4709_v14 = vld [vmem:[%s5868_s5 + $0x150] sm:$0xff]  }
 0x76b   :  { %4294 = vmatpush3.bf16.msra.mxu1 %v4652_v15  ;;  %v4710_v15 = vld [vmem:[%s5868_s5 + $0x110] sm:$0xff]  }
 0x76c   :  { %4295 = vmatprep.subr.bf16.mxu1 %v4653_v16 }
 0x76f   :  { %4296 = vmatpush3.bf16.msra.mxu1 %v4654_v17  ;;  %v4714_v17 = vld [vmem:[%s5868_s5 + $0x120] sm:$0xff]  }
 0x770   :  { %4297 = vmatprep.subr.bf16.mxu1 %v4655_v19 }
 0x773   :  { %4298 = vmatpush3.bf16.msra.mxu1 %v4656_v20  ;;  %v4715_v20 = vld [vmem:[%s5868_s5 + $0x168] sm:$0xff]  }
 0x774   :  { %4299 = vmatprep.subr.bf16.mxu1 %v4657_v21 }
 0x777   :  { %4300 = vmatpush3.bf16.msra.mxu1 %v4658_v22 }
 0x778   :  { %4301 = vmatprep.subr.bf16.mxu1 %v4659_v23 }
 0x77b   :  { %4302 = vmatpush3.bf16.msra.mxu1 %v4660_v24 }
 0x77c   :  { %4303 = vmatprep.subr.bf16.mxu1 %v4661_v25  ;;  %v4716_v25 = vld [vmem:[%s5868_s5 + $0x128] sm:$0xff]  }
 0x77f   :  { %4304 = vmatpush3.bf16.msra.mxu1 %v4662_v26  ;;  %v4717_v26 = vld [vmem:[%s5868_s5 + $0x170] sm:$0xff]  }
 0x780   :  { %4305 = vmatprep.subr.bf16.mxu1 %v4663_v29  ;;  %v4718_v29 = vld [vmem:[%s5868_s5 + $0x130] sm:$0xff]  }
 0x783   :  { %4306 = vmatpush3.bf16.msra.mxu1 %v4664_v30  ;;  %v4719_v30 = vld [vmem:[%s5868_s5 + $0x178] sm:$0xff]  }
 0x784   :  { %4335 = vmatprep.subr.bf16.mxu1 %v4665_v31  ;;  %v4720_v31 = vld [vmem:[%s5868_s5 + $0x138] sm:$0xff]  }
 0x786   :  { %2000 = vmatmul.mubr.bf16.vlgmr.msra.gmra.mrb[40].mxu1 %v5079_v27 }
 0x787   :  { %4336 = vmatpush3.bf16.msra.mxu1 %v4666_v58  ;;  %2355 = vmatprep.mubr.bf16.mxu1 %v5081_v28 }
 0x788   :  { %4337 = vmatprep.subr.bf16.mxu1 %v4667_v32  ;;  %v3934_v32 = vld [vmem:[%s5872_s9 + $0x2] ss:$0 sm:$0xff] }
 0x78b   :  { %4338 = vmatpush3.bf16.msra.mxu1 %v4668_v35 }
 0x78c   :  { %4339 = vmatprep.subr.bf16.mxu1 %v4669_v0 }
 0x78f   :  { %4340 = vmatpush3.bf16.msra.mxu1 %v4670_v4 }
 0x790   :  { %4341 = vmatprep.subr.bf16.mxu1 %v4671_v33 }
 0x793   :  { %4342 = vmatpush3.bf16.msra.mxu1 %v4672_v34 }
 0x794   :  { %4343 = vmatprep.subr.bf16.mxu1 %v4673_v36 }
 0x797   :  { %4344 = vmatpush3.bf16.msra.mxu1 %v4674_v61 }
 0x798   :  { %4345 = vmatprep.subr.bf16.mxu1 %v4675_v37 }
 0x79b   :  { %4346 = vmatpush3.bf16.msra.mxu1 %v4676_v38 }
 0x79c   :  { %4347 = vmatprep.subr.bf16.mxu1 %v4677_v39 }
 0x79f   :  { %4348 = vmatpush3.bf16.msra.mxu1 %v4678_v40  ;;  %v3884_v40 = vld [vmem:[%s5871_s8 + $0x2] ss:$0 sm:$0xff] }
 0x7a0   :  { %4349 = vmatprep.subr.bf16.mxu1 %v4679_v41 }
 0x7a3   :  { %4350 = vmatpush3.bf16.msra.mxu1 %v4680_v42 }
 0x7a4   :  { %4487 = vmatprep.subr.bf16.mxu1 %v4853_v18 }
 0x7a6   :  { %2356 = vmatmul.mubr.bf16.vlgmr.msra.gmra.mrb[44].mxu1 %v5079_v27 }
 0x7a7   :  { %4489 = vmatprep.mubr.msk.bf16.mxu1 %vm4854_vm0, %v4853_v18 }
 0x831   :  { %v1596_v49 = vpop.f32.mrb[32].mxu1 }
 0x832   :  { %v4479_v50 = vpop.f32.mrb[33].mxu1 }
 0x833   :  { %v1599_v51 = vpop.f32.mrb[34].mxu1 }
 0x834   :  { %v4480_v52 = vpop.f32.mrb[35].mxu1 }
 0x839   :  { %v1642_v53 = vpop.f32.mrb[36].mxu1 }
 0x83a   :  { %v1648_v55 = vpack.c.bf16 %v1642_v53, %v1596_v49  ;;  %v4485_v56 = vpop.f32.mrb[37].mxu1  ;;  %v3834_v49 = vld [vmem:[%s5870_s7 + $0x2] ss:$0 sm:$0xff] }
 0x83b   :  { %v1645_v59 = vpop.f32.mrb[38].mxu1 }
 0x83c   :  { %v4486_v62 = vpop.f32.mrb[39].mxu1  ;;  %3791 = vmatmul.mubr.msk.bf16.vlgmr.msra.gmra.mrb[16].mxu0 %vm676_vm1, %v1648_v55 }
 0x83d   :  { %1788 = vmatpush1.bf16.msra.mxu0 %v4693_v54  ;;  %1819 = vmatprep.mubr.bf16.mxu0 %v4855_v48 }
 0x83e   :  { %1789 = vmatprep.subr.bf16.mxu0 %v4698_v57 }
 0x841   :  { %1790 = vmatpush1.bf16.msra.mxu0 %v4696_v63 }
 0x842   :  { %1791 = vmatprep.subr.bf16.mxu0 %v4701_v1 }
 0x845   :  { %1792 = vmatpush1.bf16.msra.mxu0 %v4699_v6 }
 0x846   :  { %1793 = vmatprep.subr.bf16.mxu0 %v4704_v7 }
 0x849   :  { %1794 = vmatpush1.bf16.msra.mxu0 %v4702_v10 }
 0x84a   :  { %4313 = vmatprep.subr.bf16.mxu0 %v4705_v11 }
 0x84c   :  { %3800 = vmatmul.mubr.msk.bf16.vlgmr.msra.gmra.mrb[16].mxu0 %vm676_vm1, %v889_v3  ;;  %v4713_v3 = vld [vmem:[%s5868_s5 + $0x160] sm:$0xff]  }
 0x84d   :  { %4314 = vmatpush3.bf16.msra.mxu0 %v4706_v12  ;;  %2177 = vmatprep.mubr.bf16.mxu0 %v5081_v28 }
 0x84e   :  { %4315 = vmatprep.subr.bf16.mxu0 %v4707_v5 }
 0x851   :  { %4316 = vmatpush3.bf16.msra.mxu0 %v4708_v13 }
 0x852   :  { %4317 = vmatprep.subr.bf16.mxu0 %v4709_v14 }
 0x855   :  { %4318 = vmatpush3.bf16.msra.mxu0 %v4710_v15 }
 0x856   :  { %4319 = vmatprep.subr.bf16.mxu0 %v4711_v60 }
 0x859   :  { %v4307_v16 = vpop.f32.mrb[40].mxu1  ;;  %4320 = vmatpush3.bf16.msra.mxu0 %v4712_v2 }
 0x85a   :  { %v4308_v19 = vpop.f32.mrb[41].mxu1  ;;  %4321 = vmatprep.subr.bf16.mxu0 %v4713_v3 }
 0x85b   :  { %v4309_v21 = vadd.f32 %v4308_v19, %v4307_v16  ;;  %v4310_v22 = vpop.f32.mrb[42].mxu1 }
 0x85c   :  { %v4311_v23 = vpop.f32.mrb[43].mxu1 }
 0x85d   :  { %v4312_v24 = vadd.f32 %v4311_v23, %v4310_v22  ;;  %4322 = vmatpush3.bf16.msra.mxu0 %v4714_v17  ;;  %v2002_v52 = vadd.f32 %v4309_v21, %v3834_v49 }
 0x85e   :  { %4323 = vmatprep.subr.bf16.mxu0 %v4715_v20 }
 0x85f   :  { %v2364_v54 = vpack.c.bf16 %v2002_v52, %v2002_v52  ;;  %v2005_v56 = vadd.f32 %v4312_v24, %v3834_v49  ;;  %v4734_v49 = vld [vmem:[%s5867_s4 + $0x1b0] sm:$0xff]   ;;  %v4737_v52 = vld [vmem:[%s5869_s6 + $0x1c0] sm:$0xff]  }
 0x861   :  { %4324 = vmatpush3.bf16.msra.mxu0 %v4716_v25  ;;  %v2365_v59 = vpack.c.bf16 %v2005_v56, %v2005_v56  ;;  %v4721_v25 = vld [vmem:[%s5867_s4 + $0x1c0] sm:$0xff]   ;;  %v4741_v56 = vld [vmem:[%s5869_s6 + $0x1d0] sm:$0xff]  }
 0x862   :  { %4325 = vmatprep.subr.bf16.mxu0 %v4717_v26  ;;  %v4755_v26 = vld [vmem:[%s5873_s10 + $0x84] ss:$8 sps:$4 sm:$0xff]  }
 0x865   :  { %4326 = vmatpush3.bf16.msra.mxu0 %v4718_v29 }
 0x866   :  { %4327 = vmatprep.subr.bf16.mxu0 %v4719_v30 }
 0x869   :  { %4328 = vmatpush3.bf16.msra.mxu0 %v4720_v31 }
 0x86a   :  { %4499 = vmatprep.subr.bf16.mxu0 %v4853_v18 }
 0x86c   :  { %2178 = vmatmul.mubr.bf16.vlgmr.msra.gmra.mrb[20].mxu0 %v5079_v27 }
 0x86d   :  { %4501 = vmatprep.mubr.msk.bf16.mxu0 %vm4854_vm0, %v4853_v18 }
 0x879   :  { %v4351_v58 = vpop.f32.mrb[44].mxu1 }
 0x87a   :  { %v4352_v35 = vpop.f32.mrb[45].mxu1 }
 0x87b   :  { %v4353_v0 = vadd.f32 %v4352_v35, %v4351_v58  ;;  %v4354_v4 = vpop.f32.mrb[46].mxu1 }
 0x87c   :  { %v4355_v33 = vpop.f32.mrb[47].mxu1 }
 0x87d   :  { %v2358_v34 = vadd.f32 %v4353_v0, %v3934_v32  ;;  %v4356_v36 = vadd.f32 %v4355_v33, %v4354_v4  ;;  %v4758_v0 = vld [vmem:[%s5873_s10 + $0x94] ss:$8 sps:$4 sm:$0xff]   ;;  %v4756_v4 = vld [vmem:[%s5873_s10 + $0x90] ss:$8 sps:$4 sm:$0xff]  }
 0x87f   :  { %v2368_v61 = vpack.c.bf16 %v2358_v34, %v2358_v34  ;;  %v2361_v37 = vadd.f32 %v4356_v36, %v3934_v32  ;;  %v4753_v32 = vld [vmem:[%s5873_s10 + $0x80] ss:$8 sps:$4 sm:$0xff]  }
 0x880   :  { %v4722_v36 = vld [vmem:[%s5867_s4 + $0x180] sm:$0xff]  }
 0x881   :  { %v2492_v38 = vsel %vm799_vm2, %v2368_v61, 0  ;;  %v2369_v57 = vpack.c.bf16 %v2361_v37, %v2361_v37  ;;  %v4723_v37 = vld [vmem:[%s5867_s4 + $0x1c8] sm:$0xff]  }
 0x882   :  { %4500 = vmatpush3.bf16.msra.mxu0 %v2492_v38  ;;  %v4724_v38 = vld [vmem:[%s5867_s4 + $0x188] sm:$0xff]  }
 0x883   :  { %v2538_v62 = vsel %vm799_vm2, %v2369_v57, 0  ;;  %2633 = vmatprep.subr.bf16.mxu0 %v4755_v26  ;;  %v4742_v57 = vld [vmem:[%s5869_s6 + $0x190] sm:$0xff]  }
 0x93f   :  { %v4329_v39 = vpop.f32.mrb[20].mxu0 }
 0x940   :  { %v4330_v41 = vpop.f32.mrb[21].mxu0 }
 0x941   :  { %v4331_v42 = vadd.f32 %v4330_v41, %v4329_v39  ;;  %v4332_v43 = vpop.f32.mrb[22].mxu0  ;;  %v4725_v39 = vld [vmem:[%s5867_s4 + $0x1d0] sm:$0xff]   ;;  %v4727_v41 = vld [vmem:[%s5867_s4 + $0x1d8] sm:$0xff]  }
 0x942   :  { %v4333_v44 = vpop.f32.mrb[23].mxu0 }
 0x943   :  { %v2180_v45 = vadd.f32 %v4331_v42, %v3884_v40  ;;  %v4334_v46 = vadd.f32 %v4333_v44, %v4332_v43  ;;  %v4728_v42 = vld [vmem:[%s5867_s4 + $0x198] sm:$0xff]   ;;  %v4729_v43 = vld [vmem:[%s5867_s4 + $0x1e0] sm:$0xff]  }
 0x944   :  { %v4730_v44 = vld [vmem:[%s5867_s4 + $0x1a0] sm:$0xff]  }
 0x945   :  { %v2366_v47 = vpack.c.bf16 %v2180_v45, %v2180_v45  ;;  %v2183_v50 = vadd.f32 %v4334_v46, %v3884_v40  ;;  %v4726_v40 = vld [vmem:[%s5867_s4 + $0x190] sm:$0xff]   ;;  %v4731_v45 = vld [vmem:[%s5867_s4 + $0x1e8] sm:$0xff]  }
 0x946   :  { %v4732_v46 = vld [vmem:[%s5867_s4 + $0x1a8] sm:$0xff]  }
 0x947   :  { %v2374_v51 = vsel %vm676_vm1, %v2366_v47, 0  ;;  %v2367_v53 = vpack.c.bf16 %v2183_v50, %v2183_v50  ;;  %v4733_v47 = vld [vmem:[%s5867_s4 + $0x1f0] sm:$0xff]   ;;  %v4735_v50 = vld [vmem:[%s5867_s4 + $0x1f8] sm:$0xff]  }
 0x948   :  { %4488 = vmatpush3.bf16.xpose.msra.mxu1 %v2374_v51  ;;  %v4736_v51 = vld [vmem:[%s5867_s4 + $0x1b8] sm:$0xff]  }
 0x949   :  { %4493 = vmatprep.subr.bf16.mxu1 %v4853_v18  ;;  %v2420_v55 = vsel %vm676_vm1, %v2367_v53, 0  ;;  %v4738_v53 = vld [vmem:[%s5869_s6 + $0x180] sm:$0xff]  }
 0x94f   :  { %4490 = vmatmul.mubr.msk.bf16.vlgmr.msra.gmra.mrb[48].mxu1 %vm676_vm1, %v2364_v54  ;;  %v4739_v54 = vld [vmem:[%s5869_s6 + $0x1c8] sm:$0xff]  }
 0x950   :  { %4494 = vmatpush3.bf16.xpose.msra.mxu1 %v2420_v55  ;;  %4495 = vmatprep.mubr.msk.bf16.mxu1 %vm4854_vm0, %v4853_v18  ;;  %v4740_v55 = vld [vmem:[%s5869_s6 + $0x188] sm:$0xff]  }
 0x951   :  { %4505 = vmatprep.subr.bf16.mxu1 %v4853_v18 }
 0x957   :  { %4496 = vmatmul.mubr.msk.bf16.vlgmr.msra.gmra.mrb[52].mxu1 %vm676_vm1, %v2365_v59  ;;  %v4743_v59 = vld [vmem:[%s5869_s6 + $0x1d8] sm:$0xff]  }
 0x958   :  { %4506 = vmatpush3.bf16.msra.mxu1 %v2538_v62  ;;  %4507 = vmatprep.mubr.msk.bf16.mxu1 %vm4854_vm0, %v4853_v18  ;;  %v4744_v62 = vld [vmem:[%s5869_s6 + $0x198] sm:$0xff]  }
 0x959   :  { %4365 = vmatprep.subr.bf16.mxu1 %v4721_v25 }
 0xa22   :  { %v2410_v63 = vpop.f32.mrb[48].mxu1 }
 0xa23   :  { %v2462_v1 = vmul.f32 0.125, %v2410_v63  ;;  %v4491_v6 = vpop.f32.mrb[49].mxu1  ;;  %v4745_v63 = vld [vmem:[%s5869_s6 + $0x1e0] sm:$0xff]  }
 0xa24   :  { %v2413_v7 = vpop.f32.mrb[50].mxu1  ;;  %v4747_v6 = vld [vmem:[%s5869_s6 + $0x1e8] sm:$0xff]  }
 0xa25   :  { %v4492_v10 = vpop.f32.mrb[51].mxu1  ;;  %v2464_v11 = vsel %vm771_vm3, %v2462_v1, -inf  ;;  %v4748_v7 = vld [vmem:[%s5869_s6 + $0x1a8] sm:$0xff]  }
 0xa26   :  { %2465 = vmax.xlane.f32.xlu0 %v2464_v11  ;;  %v4749_v10 = vld [vmem:[%s5869_s6 + $0x1f0] sm:$0xff]  }
 0xa27   :  { %v4750_v11 = vld [vmem:[%s5869_s6 + $0x1b0] sm:$0xff]  }
 0xa2a   :  { %v2456_v12 = vpop.f32.mrb[52].mxu1 }
 0xa2b   :  { %v2463_v5 = vmul.f32 0.125, %v2456_v12  ;;  %v4497_v13 = vpop.f32.mrb[53].mxu1  ;;  %v4751_v12 = vld [vmem:[%s5869_s6 + $0x1f8] sm:$0xff]  }
 0xa2c   :  { %v2459_v14 = vpop.f32.mrb[54].mxu1  ;;  %v4761_v13 = vld [vmem:[%s5873_s10 + $0xa4] ss:$8 sps:$4 sm:$0xff]  }
 0xa2d   :  { %v4498_v15 = vpop.f32.mrb[55].mxu1  ;;  %v2467_v60 = vsel %vm771_vm3, %v2463_v5, -inf  ;;  %v4759_v14 = vld [vmem:[%s5873_s10 + $0xa0] ss:$8 sps:$4 sm:$0xff]  }
 0xa2e   :  { %2468 = vmax.xlane.f32.xlu1 %v2467_v60  ;;  %v4764_v15 = vld [vmem:[%s5873_s10 + $0xb4] ss:$8 sps:$4 sm:$0xff]   ;;  %v4762_v60 = vld [vmem:[%s5873_s10 + $0xb0] ss:$8 sps:$4 sm:$0xff]  }
 0xab3   :  { %v2466_v2 = vpop.xlane.xlu0 %2465 }
 0xab4   :  { %v2470_v3 = vsub.f32 %v2462_v1, %v2466_v2  ;;  %v4746_v1 = vld [vmem:[%s5869_s6 + $0x1a0] sm:$0xff]  }
 0xab5   :  { %v4765_v2 = vld [vmem:[%s5868_s5 + $0x1c0] sm:$0xff]  }
 0xab6   :  { %v2472_v16 = vmul.f32 1.442695, %v2470_v3 }
 0xab8   :  { %4813 = vpow2.f32 %v2472_v16 }
 0xabb   :  { %v2469_v17 = vpop.xlane.xlu1 %2468 }
 0xabc   :  { %v2471_v19 = vsub.f32 %v2463_v5, %v2469_v17  ;;  %v4752_v5 = vld [vmem:[%s5869_s6 + $0x1b8] sm:$0xff]  }
 0xabe   :  { %v2474_v20 = vmul.f32 1.442695, %v2471_v19 }
 0xac0   :  { %4815 = vpow2.f32 %v2474_v20 }
 0xac2   :  { %v4814_v21 = vpop.eup %4813 }
 0xac3   :  { %v2476_v22 = vsel %vm771_vm3, %v4814_v21, 0.0 }
 0xac4   :  { %2477 = vadd.xlane.f32.xlu0 %v2476_v22 }
 0xaca   :  { %v4816_v23 = vpop.eup %4815 }
 0xacb   :  { %v2479_v24 = vsel %vm771_vm3, %v4816_v23, 0.0 }
 0xacc   :  { %2480 = vadd.xlane.f32.xlu1 %v2479_v24  ;;  %v4767_v24 = vld [vmem:[%s5868_s5 + $0x1c8] sm:$0xff]  }
 0xb51   :  { %v2478_v29 = vpop.xlane.xlu0 %2477 }
 0xb52   :  { %4817 = vrcp.f32 %v2478_v29  ;;  %v4768_v29 = vld [vmem:[%s5868_s5 + $0x188] sm:$0xff]  }
 0xb59   :  { %v2481_v30 = vpop.xlane.xlu1 %2480 }
 0xb5a   :  { %4819 = vrcp.f32 %v2481_v30  ;;  %v4769_v30 = vld [vmem:[%s5868_s5 + $0x1d0] sm:$0xff]  }
 0xb5c   :  { %v4818_v31 = vpop.eup %4817 }
 0xb5d   :  { %v2484_v58 = vmul.f32 %v4818_v31, %v4814_v21  ;;  %v4766_v21 = vld [vmem:[%s5868_s5 + $0x180] sm:$0xff]   ;;  %v4770_v31 = vld [vmem:[%s5868_s5 + $0x190] sm:$0xff]  }
 0xb5f   :  { %v2486_v35 = vpack.c.bf16 %v2484_v58, %v2484_v58  ;;  %v4771_v58 = vld [vmem:[%s5868_s5 + $0x1d8] sm:$0xff]  }
 0xb61   :  { %4502 = vmatmul.mubr.msk.bf16.vlgmr.msra.gmra.mrb[24].mxu0 %vm771_vm3, %v2486_v35  ;;  %v4774_v35 = vld [vmem:[%s5868_s5 + $0x1a0] sm:$0xff]  }
 0xb62   :  { %2634 = vmatpush1.bf16.msra.mxu0 %v4753_v32  ;;  %2665 = vmatprep.mubr.bf16.mxu0 %v4855_v48  ;;  %v4773_v32 = vld [vmem:[%s5868_s5 + $0x1e0] sm:$0xff]  }
 0xb63   :  { %2635 = vmatprep.subr.bf16.mxu0 %v4758_v0  ;;  %v4775_v0 = vld [vmem:[%s5868_s5 + $0x1e8] sm:$0xff]  }
 0xb64   :  { %v4820_v33 = vpop.eup %4819 }
 0xb65   :  { %v2485_v34 = vmul.f32 %v4820_v33, %v4816_v23  ;;  %v4777_v33 = vld [vmem:[%s5868_s5 + $0x1f0] sm:$0xff]  }
 0xb66   :  { %2636 = vmatpush1.bf16.msra.mxu0 %v4756_v4  ;;  %v4776_v4 = vld [vmem:[%s5868_s5 + $0x1a8] sm:$0xff]  }
 0xb67   :  { %v2487_v61 = vpack.c.bf16 %v2485_v34, %v2485_v34  ;;  %2637 = vmatprep.subr.bf16.mxu0 %v4761_v13  ;;  %v4778_v34 = vld [vmem:[%s5868_s5 + $0x1b0] sm:$0xff]  }
 0xb69   :  { %4508 = vmatmul.mubr.msk.bf16.vlgmr.msra.gmra.mrb[56].mxu1 %vm771_vm3, %v2487_v61  ;;  %v4780_v61 = vld [vmem:[%s5868_s5 + $0x1b8] sm:$0xff]  }
 0xb6a   :  { %4366 = vmatpush3.bf16.msra.mxu1 %v4722_v36  ;;  %2849 = vmatprep.mubr.bf16.mxu1 %v5081_v28  ;;  %v4779_v36 = vld [vmem:[%s5868_s5 + $0x1f8] sm:$0xff]  }
 0xb6b   :  { %4367 = vmatprep.subr.bf16.mxu1 %v4723_v37  ;;  %2638 = vmatpush1.bf16.msra.mxu0 %v4759_v14 }
 0xb6c   :  { %2639 = vmatprep.subr.bf16.mxu0 %v4764_v15 }
 0xb6e   :  { %4368 = vmatpush3.bf16.msra.mxu1 %v4724_v38 }
 0xb6f   :  { %4369 = vmatprep.subr.bf16.mxu1 %v4725_v39  ;;  %2640 = vmatpush1.bf16.msra.mxu0 %v4762_v60 }
 0xb70   :  { %4387 = vmatprep.subr.bf16.mxu0 %v4765_v2 }
 0xb72   :  { %4370 = vmatpush3.bf16.msra.mxu1 %v4726_v40 }
 0xb73   :  { %4371 = vmatprep.subr.bf16.mxu1 %v4727_v41 }
 0xb76   :  { %4372 = vmatpush3.bf16.msra.mxu1 %v4728_v42 }
 0xb77   :  { %4373 = vmatprep.subr.bf16.mxu1 %v4729_v43 }
 0xb7a   :  { %4374 = vmatpush3.bf16.msra.mxu1 %v4730_v44  ;;  %v4105_v44 = vld [vmem:[%s5872_s9 + $0x3] ss:$0 sm:$0xff] }
 0xb7b   :  { %4375 = vmatprep.subr.bf16.mxu1 %v4731_v45 }
 0xb7e   :  { %4376 = vmatpush3.bf16.msra.mxu1 %v4732_v46 }
 0xb7f   :  { %4377 = vmatprep.subr.bf16.mxu1 %v4733_v47 }
 0xb82   :  { %4378 = vmatpush3.bf16.msra.mxu1 %v4734_v49 }
 0xb83   :  { %4379 = vmatprep.subr.bf16.mxu1 %v4735_v50 }
 0xb86   :  { %4380 = vmatpush3.bf16.msra.mxu1 %v4736_v51 }
 0xb87   :  { %4409 = vmatprep.subr.bf16.mxu1 %v4737_v52 }
 0xb89   :  { %2850 = vmatmul.mubr.bf16.vlgmr.msra.gmra.mrb[60].mxu1 %v5079_v27 }
 0xb8a   :  { %4410 = vmatpush3.bf16.msra.mxu1 %v4738_v53  ;;  %3205 = vmatprep.mubr.bf16.mxu1 %v5081_v28 }
 0xb8b   :  { %4411 = vmatprep.subr.bf16.mxu1 %v4739_v54 }
 0xb8e   :  { %4412 = vmatpush3.bf16.msra.mxu1 %v4740_v55  ;;  %v4055_v55 = vld [vmem:[%s5871_s8 + $0x3] ss:$0 sm:$0xff] }
 0xb8f   :  { %4413 = vmatprep.subr.bf16.mxu1 %v4741_v56 }
 0xb92   :  { %4414 = vmatpush3.bf16.msra.mxu1 %v4742_v57 }
 0xb93   :  { %4415 = vmatprep.subr.bf16.mxu1 %v4743_v59 }
 0xb96   :  { %4416 = vmatpush3.bf16.msra.mxu1 %v4744_v62 }
 0xb97   :  { %4417 = vmatprep.subr.bf16.mxu1 %v4745_v63 }
 0xb9a   :  { %4418 = vmatpush3.bf16.msra.mxu1 %v4746_v1 }
 0xb9b   :  { %4419 = vmatprep.subr.bf16.mxu1 %v4747_v6 }
 0xb9e   :  { %4420 = vmatpush3.bf16.msra.mxu1 %v4748_v7  ;;  %v4005_v7 = vld [vmem:[%s5870_s7 + $0x3] ss:$0 sm:$0xff] }
 0xb9f   :  { %4421 = vmatprep.subr.bf16.mxu1 %v4749_v10 }
 0xba2   :  { %4422 = vmatpush3.bf16.msra.mxu1 %v4750_v11 }
 0xba3   :  { %4423 = vmatprep.subr.bf16.mxu1 %v4751_v12 }
 0xba6   :  { %4424 = vmatpush3.bf16.msra.mxu1 %v4752_v5 }
 0xba7   :  { %4529 = vmatprep.subr.bf16.mxu1 %v4853_v18 }
 0xba9   :  { %3206 = vmatmul.mubr.bf16.vlgmr.msra.gmra.mrb[64].mxu1 %v5079_v27 }
 0xbaa   :  { %4531 = vmatprep.mubr.msk.bf16.mxu1 %vm4854_vm0, %v4853_v18 }
 0xc34   :  { %v2528_v3 = vpop.f32.mrb[24].mxu0 }
 0xc35   :  { %v4503_v16 = vpop.f32.mrb[25].mxu0 }
 0xc36   :  { %v2531_v17 = vpop.f32.mrb[26].mxu0 }
 0xc37   :  { %v4504_v19 = vpop.f32.mrb[27].mxu0 }
 0xc3c   :  { %v2574_v20 = vpop.f32.mrb[56].mxu1 }
 0xc3d   :  { %v2580_v22 = vpack.c.bf16 %v2574_v20, %v2528_v3  ;;  %v4509_v23 = vpop.f32.mrb[57].mxu1 }
 0xc3e   :  { %v2577_v25 = vpop.f32.mrb[58].mxu1 }
 0xc3f   :  { %v4510_v26 = vpop.f32.mrb[59].mxu1  ;;  %3971 = vmatmul.mubr.msk.bf16.vlgmr.msra.gmra.mrb[16].mxu0 %vm676_vm1, %v2580_v22 }
 0xc40   :  { %4388 = vmatpush3.bf16.msra.mxu0 %v4766_v21  ;;  %3027 = vmatprep.mubr.bf16.mxu0 %v5081_v28  ;;  %v4772_v28 = vld [vmem:[%s5868_s5 + $0x198] sm:$0xff]  }
 0xc41   :  { %4389 = vmatprep.subr.bf16.mxu0 %v4767_v24 }
 0xc44   :  { %4390 = vmatpush3.bf16.msra.mxu0 %v4768_v29 }
 0xc45   :  { %4391 = vmatprep.subr.bf16.mxu0 %v4769_v30 }
 0xc48   :  { %4392 = vmatpush3.bf16.msra.mxu0 %v4770_v31 }
 0xc49   :  { %4393 = vmatprep.subr.bf16.mxu0 %v4771_v58 }
 0xc4c   :  { %4394 = vmatpush3.bf16.msra.mxu0 %v4772_v28 }
 0xc4d   :  { %4395 = vmatprep.subr.bf16.mxu0 %v4773_v32 }
 0xc50   :  { %4396 = vmatpush3.bf16.msra.mxu0 %v4774_v35 }
 0xc51   :  { %4397 = vmatprep.subr.bf16.mxu0 %v4775_v0 }
 0xc54   :  { %4398 = vmatpush3.bf16.msra.mxu0 %v4776_v4 }
 0xc55   :  { %4399 = vmatprep.subr.bf16.mxu0 %v4777_v33 }
 0xc58   :  { %4400 = vmatpush3.bf16.msra.mxu0 %v4778_v34 }
 0xc59   :  { %4401 = vmatprep.subr.bf16.mxu0 %v4779_v36  ;;  %v4783_v36 = vld [vmem:[%s5873_s10 + $0xc4] ss:$8 sps:$4 sm:$0xff]  }
 0xc5c   :  { %v4381_v37 = vpop.f32.mrb[60].mxu1  ;;  %4402 = vmatpush3.bf16.msra.mxu0 %v4780_v61 }
 0xc5d   :  { %v4382_v38 = vpop.f32.mrb[61].mxu1  ;;  %4511 = vmatprep.subr.bf16.mxu0 %v4853_v18 }
 0xc5e   :  { %v4383_v39 = vadd.f32 %v4382_v38, %v4381_v37  ;;  %v4384_v40 = vpop.f32.mrb[62].mxu1 }
 0xc5f   :  { %v4385_v41 = vpop.f32.mrb[63].mxu1  ;;  %3028 = vmatmul.mubr.bf16.vlgmr.msra.gmra.mrb[28].mxu0 %v5079_v27 }
 0xc60   :  { %v4386_v42 = vadd.f32 %v4385_v41, %v4384_v40  ;;  %4513 = vmatprep.mubr.msk.bf16.mxu0 %vm4854_vm0, %v4853_v18  ;;  %v2852_v12 = vadd.f32 %v4383_v39, %v4005_v7  ;;  %v4781_v40 = vld [vmem:[%s5873_s10 + $0xc0] ss:$8 sps:$4 sm:$0xff]  }
 0xc62   :  { %v3214_v13 = vpack.c.bf16 %v2852_v12, %v2852_v12  ;;  %v2855_v15 = vadd.f32 %v4386_v42, %v4005_v7  ;;  %v4786_v42 = vld [vmem:[%s5873_s10 + $0xd4] ss:$8 sps:$4 sm:$0xff]  }
 0xc64   :  { %v3215_v2 = vpack.c.bf16 %v2855_v15, %v2855_v15 }
 0xc7c   :  { %v4425_v43 = vpop.f32.mrb[64].mxu1 }
 0xc7d   :  { %v4426_v45 = vpop.f32.mrb[65].mxu1 }
 0xc7e   :  { %v4427_v46 = vadd.f32 %v4426_v45, %v4425_v43  ;;  %v4428_v47 = vpop.f32.mrb[66].mxu1  ;;  %v4784_v43 = vld [vmem:[%s5873_s10 + $0xd0] ss:$8 sps:$4 sm:$0xff]  }
 0xc7f   :  { %v4429_v49 = vpop.f32.mrb[67].mxu1 }
 0xc80   :  { %v3208_v50 = vadd.f32 %v4427_v46, %v4105_v44  ;;  %v4430_v51 = vadd.f32 %v4429_v49, %v4428_v47  ;;  %v4789_v47 = vld [vmem:[%s5873_s10 + $0xe4] ss:$8 sps:$4 sm:$0xff]   ;;  %v4787_v49 = vld [vmem:[%s5873_s10 + $0xe0] ss:$8 sps:$4 sm:$0xff]  }
 0xc82   :  { %v3211_v52 = vadd.f32 %v4430_v51, %v4105_v44  ;;  %v3218_v60 = vpack.c.bf16 %v3208_v50, %v3208_v50  ;;  %v4790_v50 = vld [vmem:[%s5873_s10 + $0xf0] ss:$8 sps:$4 sm:$0xff]  }
 0xc84   :  { %v3219_v53 = vpack.c.bf16 %v3211_v52, %v3211_v52  ;;  %v3342_v3 = vsel %vm799_vm2, %v3218_v60, 0 }
 0xc86   :  { %v3388_v54 = vsel %vm799_vm2, %v3219_v53, 0 }
 0xc87   :  { %4530 = vmatpush3.bf16.msra.mxu1 %v3388_v54 }
 0xd32   :  { %v4403_v27 = vpop.f32.mrb[28].mxu0 }
 0xd33   :  { %v4404_v56 = vpop.f32.mrb[29].mxu0 }
 0xd34   :  { %v4405_v57 = vadd.f32 %v4404_v56, %v4403_v27  ;;  %v4406_v59 = vpop.f32.mrb[30].mxu0 }
 0xd35   :  { %v4407_v62 = vpop.f32.mrb[31].mxu0 }
 0xd36   :  { %v3030_v63 = vadd.f32 %v4405_v57, %v4055_v55  ;;  %v4408_v1 = vadd.f32 %v4407_v62, %v4406_v59  ;;  %v3530_v62 = vld [vmem:[%s5874_s11] sm:$0x3] }
 0xd38   :  { %v3216_v6 = vpack.c.bf16 %v3030_v63, %v3030_v63  ;;  %v3033_v10 = vadd.f32 %v4408_v1, %v4055_v55  ;;  %v3535_v63 = vrot.slane %v3530_v62, %v4942_v8  ;;  %v3539_v1 = vrot.slane %v3530_v62, %v4944_v9 }
 0xd3a   :  { %v3224_v11 = vsel %vm676_vm1, %v3216_v6, 0  ;;  %v3217_v5 = vpack.c.bf16 %v3033_v10, %v3033_v10 }
 0xd3b   :  { %4512 = vmatpush3.bf16.xpose.msra.mxu0 %v3224_v11 }
 0xd3c   :  { %4517 = vmatprep.subr.bf16.mxu0 %v4853_v18  ;;  %v3270_v14 = vsel %vm676_vm1, %v3217_v5, 0 }
 0xd42   :  { %4514 = vmatmul.mubr.msk.bf16.vlgmr.msra.gmra.mrb[32].mxu0 %vm676_vm1, %v3214_v13 }
 0xd43   :  { %4518 = vmatpush3.bf16.xpose.msra.mxu0 %v3270_v14  ;;  %4519 = vmatprep.mubr.msk.bf16.mxu0 %vm4854_vm0, %v4853_v18 }
 0xd44   :  { %4523 = vmatprep.subr.bf16.mxu0 %v4853_v18 }
 0xd4a   :  { %4520 = vmatmul.mubr.msk.bf16.vlgmr.msra.gmra.mrb[36].mxu0 %vm676_vm1, %v3215_v2 }
 0xd4b   :  { %4524 = vmatpush3.bf16.msra.mxu0 %v3342_v3  ;;  %4525 = vmatprep.mubr.msk.bf16.mxu0 %vm4854_vm0, %v4853_v18 }
 0xd4c   :  { %3483 = vmatprep.subr.bf16.mxu0 %v4783_v36 }
 0xe15   :  { %v3260_v16 = vpop.f32.mrb[32].mxu0 }
 0xe16   :  { %v3312_v17 = vmul.f32 0.125, %v3260_v16  ;;  %v4515_v19 = vpop.f32.mrb[33].mxu0 }
 0xe17   :  { %v3263_v20 = vpop.f32.mrb[34].mxu0 }
 0xe18   :  { %v4516_v21 = vpop.f32.mrb[35].mxu0  ;;  %v3314_v22 = vsel %vm771_vm3, %v3312_v17, -inf }
 0xe19   :  { %3315 = vmax.xlane.f32.xlu0 %v3314_v22 }
 0xe1d   :  { %v3306_v23 = vpop.f32.mrb[36].mxu0 }
 0xe1e   :  { %v3313_v24 = vmul.f32 0.125, %v3306_v23  ;;  %v4521_v25 = vpop.f32.mrb[37].mxu0 }
 0xe1f   :  { %v3309_v26 = vpop.f32.mrb[38].mxu0 }
 0xe20   :  { %v4522_v29 = vpop.f32.mrb[39].mxu0  ;;  %v3317_v30 = vsel %vm771_vm3, %v3313_v24, -inf }
 0xe21   :  { %3318 = vmax.xlane.f32.xlu1 %v3317_v30 }
 0xea6   :  { %v3316_v31 = vpop.xlane.xlu0 %3315 }
 0xea7   :  { %v3320_v58 = vsub.f32 %v3312_v17, %v3316_v31 }
 0xea9   :  { %v3322_v28 = vmul.f32 1.442695, %v3320_v58 }
 0xeab   :  { %4821 = vpow2.f32 %v3322_v28 }
 0xeae   :  { %v3319_v18 = vpop.xlane.xlu1 %3318 }
 0xeaf   :  { %v3321_v32 = vsub.f32 %v3313_v24, %v3319_v18 }
 0xeb1   :  { %v3324_v35 = vmul.f32 1.442695, %v3321_v32 }
 0xeb3   :  { %4823 = vpow2.f32 %v3324_v35 }
 0xeb5   :  { %v4822_v0 = vpop.eup %4821 }
 0xeb6   :  { %v3326_v4 = vsel %vm771_vm3, %v4822_v0, 0.0 }
 0xeb7   :  { %3327 = vadd.xlane.f32.xlu0 %v3326_v4 }
 0xebd   :  { %v4824_v33 = vpop.eup %4823 }
 0xebe   :  { %v3329_v34 = vsel %vm771_vm3, %v4824_v33, 0.0 }
 0xebf   :  { %3330 = vadd.xlane.f32.xlu1 %v3329_v34 }
 0xf44   :  { %v3328_v61 = vpop.xlane.xlu0 %3327 }
 0xf45   :  { %4825 = vrcp.f32 %v3328_v61 }
 0xf4c   :  { %v3331_v37 = vpop.xlane.xlu1 %3330 }
 0xf4d   :  { %4827 = vrcp.f32 %v3331_v37 }
 0xf4f   :  { %v4826_v38 = vpop.eup %4825 }
 0xf50   :  { %v3334_v39 = vmul.f32 %v4826_v38, %v4822_v0 }
 0xf52   :  { %v3336_v41 = vpack.c.bf16 %v3334_v39, %v3334_v39 }
 0xf54   :  { %4526 = vmatmul.mubr.msk.bf16.vlgmr.msra.gmra.mrb[40].mxu0 %vm771_vm3, %v3336_v41 }
 0xf55   :  { %3484 = vmatpush1.bf16.msra.mxu0 %v4781_v40  ;;  %3515 = vmatprep.mubr.bf16.mxu0 %v4855_v48  ;;  %v4792_v48 = vld [vmem:[%s5873_s10 + $0xf4] ss:$8 sps:$4 sm:$0xff]   ;;  %s4856_s10 = smov [#allocation2]  }
 0xf56   :  { %3485 = vmatprep.subr.bf16.mxu0 %v4786_v42  ;;  %s3555_s3 = sshll.u32 %s4856_s10, 4  ;;  %s3556_s3 = int_to_ptr.vmem [resolvable:$true] %s3555_s3 }
 0xf57   :  { %v4828_v44 = vpop.eup %4827  ;;  %s4829_s11 = scalar_lea.vmem %s3556_s3, 512  ;;  %p4834_p1 = scmp.lt.s32.totalorder %s3556_s3, %s3556_s3 }
 0xf58   :  { %v3335_v45 = vmul.f32 %v4828_v44, %v4824_v33  ;;  %p4830_p0 = scmp.ne.s32.totalorder %s3556_s3, %s4829_s11  ;;  %p4835_p2 = scmp.lt.s32.totalorder %s4829_s11, %s4829_s11 }
 0xf59   :  { %3486 = vmatpush1.bf16.msra.mxu0 %v4784_v43 }
 0xf5a   :  { %v3337_v46 = vpack.c.bf16 %v3335_v45, %v3335_v45  ;;  %3487 = vmatprep.subr.bf16.mxu0 %v4789_v47  ;;  %p4836_p3 = por %p4835_p2, %p4834_p1 }
 0xf5c   :  { %4532 = vmatmul.mubr.msk.bf16.vlgmr.msra.gmra.mrb[68].mxu1 %vm771_vm3, %v3337_v46  ;;  %p4837_p4 = pnand %p4836_p3, %p4830_p0 }
 0xf5d   :  { %3488 = vmatpush1.bf16.msra.mxu0 %v4787_v49 }
 0xf5e   :  { %3489 = vmatprep.subr.bf16.mxu0 %v4792_v48 }
 0xf61   :  { %3490 = vmatpush1.bf16.msra.mxu0 %v4790_v50 }
0x1027   :  { %v3378_v51 = vpop.f32.mrb[40].mxu0 }
0x1028   :  { %v4527_v52 = vpop.f32.mrb[41].mxu0 }
0x1029   :  { %v3381_v53 = vpop.f32.mrb[42].mxu0 }
0x102a   :  { %v4528_v54 = vpop.f32.mrb[43].mxu0 }
0x102f   :  { %v3424_v27 = vpop.f32.mrb[68].mxu1 }
0x1030   :  { %v3430_v55 = vpack.c.bf16 %v3424_v27, %v3378_v51  ;;  %v4533_v56 = vpop.f32.mrb[69].mxu1 }
0x1031   :  { %v3427_v57 = vpop.f32.mrb[70].mxu1 }
0x1032   :  { %v4534_v59 = vpop.f32.mrb[71].mxu1  ;;  %4142 = vmatmul.mubr.msk.bf16.vlgmr.msra.gmra.mrb[16].mxu0 %vm676_vm1, %v3430_v55 }
0x1105   :  { %v3517_v6 = vpop.f32.mrb[16].mxu0 }
0x1106   :  { %v3542_v7 = vadd.f32 %v3535_v63, %v3517_v6  ;;  %v3519_v10 = vpop.f32.mrb[17].mxu0 }
0x1107   :  { %v3543_v11 = vadd.f32 %v3539_v1, %v3519_v10  ;;  %v3521_v12 = vpop.f32.mrb[18].mxu0 }
0x1108   :  { %3546 = vst [vmem:[#allocation2] sm:$0xff] %v3542_v7  ;;  %v3544_v5 = vadd.f32 %v3535_v63, %v3521_v12  ;;  %v3523_v13 = vpop.f32.mrb[19].mxu0 }
0x1109   :  { %3547 = vst [vmem:[#allocation2 + $0x8] sm:$0xff] %v3543_v11  ;;  %v3545_v14 = vadd.f32 %v3539_v1, %v3523_v13 }
0x110a   :  { %3548 = vst [vmem:[#allocation2 + $0x10] sm:$0xff] %v3544_v5 }
0x110b   :  { %3549 = vst [vmem:[#allocation2 + $0x18] sm:$0xff] %v3545_v14 }
0x110c   :  { %4840 = shalt.err (!%p4837_p4)
}
0x110d   :  { %s4841_s25 = scalar_lea.hbm %s5875_s12, 512 }
0x110e   :  { %p4842_p5 = scmp.ne.s32.totalorder %s5875_s12, %s4841_s25  ;;  %p4845_p6 = scmp.lt.u32.totalorder %s4841_s25, %s5875_s12 }
0x1110   :  { %p4847_p7 = pnand %p4845_p6, %p4842_p5 }
0x1112   :  { %4850 = shalt.err (!%p4847_p7)
}
0x1113   :  { %s4857_s9 = smov 256   ;;  %s4858_s29 = smov 16  }
0x1114   :  { %3561 = dma.vmem_to_hbm [thread:$0]  %s3556_s3, 512, %s5875_s12, [#allocation3], %s4857_s9, %s4857_s9, %s4858_s29  }
0x1115   :  { %4851 = dma.done.wait [#allocation3], 512  }
0x1116   :  { %4852 = vsyncadd [#allocation3], 4294966784 }
0x1117   :  { %3565 = vsyncpa [#allocation3], 1 }

</bundles_post_ra>
